<compile_context>
chip_gen: v6e
topology: v6e:2x2x1
jax: 0.10.0
libtpu: 0.0.40
codegen_flags: <defaults>
</compile_context>

<pallas_src>
import functools
import math

import jax
import jax.numpy as jnp
from jax.experimental import pallas as pl
from jax.experimental.pallas import tpu as pltpu


def _encoder_stack_kernel(num_heads, seq_len,
                          x_ref, mask_ref,
                          wq_ref, bq_ref, wk_ref, bk_ref, wv_ref, bv_ref,
                          woh_ref, bo_ref,
                          g1_ref, be1_ref,
                          w1_ref, bf1_ref, w2_ref, bf2_ref,
                          g2_ref, be2_ref,
                          out_ref,
                          act_ref, ctx_ref):
    l = pl.program_id(0)
    num_layers = pl.num_programs(0)

    H = num_heads
    S = seq_len
    N, D = act_ref.shape            # N = B * S (flattened rows)
    Dh = D // H
    B = N // S
    scale = 1.0 / math.sqrt(Dh)

    # Layer 0: load the input activations into the resident VMEM buffer.
    @pl.when(l == 0)
    def _():
        act_ref[...] = x_ref[...]

    x = act_ref[...]                              # (N, D) f32, resident across layers
    x_bf = x.astype(jnp.bfloat16)
    mask = mask_ref[...]                          # (S, S) additive bias (0 or -1e9)

    wq = wq_ref[0]; wk = wk_ref[0]; wv = wv_ref[0]        # (D, D)  bf16
    woh = woh_ref[0]                                      # (H, Dh, D) bf16
    w1 = w1_ref[0]; w2 = w2_ref[0]                        # (D, F), (F, D) bf16
    bq = bq_ref[0]; bk = bk_ref[0]; bv = bv_ref[0]        # (1, D) f32
    bo = bo_ref[0]; bf1 = bf1_ref[0]; bf2 = bf2_ref[0]
    g1 = g1_ref[0]; be1 = be1_ref[0]
    g2 = g2_ref[0]; be2 = be2_ref[0]

    # ---- QKV projections: flat (B*S, D) x (D, D) MXU matmuls, bf16 in / f32 acc ----
    q = jnp.dot(x_bf, wq, preferred_element_type=jnp.float32) + bq
    k = jnp.dot(x_bf, wk, preferred_element_type=jnp.float32) + bk
    v = jnp.dot(x_bf, wv, preferred_element_type=jnp.float32) + bv

    # Head-major relayout (H, N, Dh): static lane slices stacked on a new major axis.
    def heads(t):
        return jnp.stack(
            [t[:, h * Dh:(h + 1) * Dh] for h in range(H)], axis=0
        ).astype(jnp.bfloat16)

    qh, kh, vh = heads(q), heads(k), heads(v)

    # ---- Attention: head-batched einsums, one batch element per static loop step ----
    for b in range(B):
        r0 = b * S
        qb = qh[:, r0:r0 + S, :]                  # (H, S, Dh) bf16
        kb = kh[:, r0:r0 + S, :]
        vb = vh[:, r0:r0 + S, :]
        s = jnp.einsum('hqd,hkd->hqk', qb, kb,
                       preferred_element_type=jnp.float32)   # (H, S, S) f32
        s = s * scale + mask[None]
        s = s - jnp.max(s, axis=-1, keepdims=True)
        p = jnp.exp(s)
        denom = jnp.sum(p, axis=-1, keepdims=True)
        p = p * pl.reciprocal(denom, approx=True)
        ctx_ref[:, r0:r0 + S, :] = jnp.einsum(
            'hqk,hkd->hqd', p.astype(jnp.bfloat16), vb,
            preferred_element_type=jnp.float32)               # (H, S, Dh) f32

    # ---- Output projection: per-head (Dh, D) blocks of Wo, summed over heads ----
    # (equivalent to concat(heads) @ Wo, but with no lane concatenation)
    ctx = ctx_ref[...].astype(jnp.bfloat16)                   # (H, N, Dh)
    attn = jnp.einsum('hnd,hde->hne', ctx, woh,
                      preferred_element_type=jnp.float32).sum(axis=0) + bo   # (N, D)

    # ---- residual + LayerNorm 1 (f32, eps = 1e-5, PyTorch default) ----
    h1 = x + attn
    mu = jnp.mean(h1, axis=-1, keepdims=True)
    var = jnp.mean((h1 - mu) ** 2, axis=-1, keepdims=True)
    h1n = (h1 - mu) * jax.lax.rsqrt(var + 1e-5) * g1 + be1

    # ---- position-wise FFN: flat (B*S, D)x(D, F) and (B*S, F)x(F, D), bf16/f32 ----
    ff = jnp.dot(h1n.astype(jnp.bfloat16), w1,
                 preferred_element_type=jnp.float32) + bf1
    ff = jnp.maximum(ff, 0.0)
    ff = jnp.dot(ff.astype(jnp.bfloat16), w2,
                 preferred_element_type=jnp.float32) + bf2

    # ---- residual + LayerNorm 2 ----
    h2 = h1n + ff
    mu2 = jnp.mean(h2, axis=-1, keepdims=True)
    var2 = jnp.mean((h2 - mu2) ** 2, axis=-1, keepdims=True)
    y = (h2 - mu2) * jax.lax.rsqrt(var2 + 1e-5) * g2 + be2

    act_ref[...] = y                               # stays resident for the next layer

    @pl.when(l == num_layers - 1)
    def _():
        out_ref[...] = y                           # single HBM writeback


def encoder_forward(x, params, num_heads, mask=None):
    """x: (B, S, D) f32. params: dict of per-layer-stacked arrays (leading L axis)."""
    B, S, D = x.shape
    L = params["wq"].shape[0]
    F = params["w1"].shape[-1]
    H = num_heads
    Dh = D // H
    N = B * S

    if mask is None:
        mask_bias = jnp.zeros((S, S), jnp.float32)
    else:
        # PyTorch-style masked_fill(mask == 0, -1e9) expressed as an additive bias.
        mask_bias = jnp.where(mask.astype(bool), 0.0, -1e9).astype(jnp.float32)

    x2d = x.reshape(N, D).astype(jnp.float32)

    bf16 = lambda a: a.astype(jnp.bfloat16)
    f32 = lambda a: a.astype(jnp.float32)

    wq, wk, wv = bf16(params["wq"]), bf16(params["wk"]), bf16(params["wv"])
    woh = bf16(params["wo"].reshape(L, H, Dh, D))     # head-blocked rows of Wo
    w1, w2 = bf16(params["w1"]), bf16(params["w2"])

    bq, bk, bv, bo = map(f32, (params["bq"], params["bk"], params["bv"], params["bo"]))
    bf1, bf2 = f32(params["bf1"]), f32(params["bf2"])
    g1, be1 = f32(params["g1"]), f32(params["be1"])
    g2, be2 = f32(params["g2"]), f32(params["be2"])

    def stacked(shape):      # per-layer block of a param stacked along leading L axis
        nd = len(shape)
        return pl.BlockSpec((1,) + shape, lambda l, _nd=nd: (l,) + (0,) * _nd)

    def fixed(shape):        # layer-invariant input (activations, mask)
        nd = len(shape)
        return pl.BlockSpec(shape, lambda l, _nd=nd: (0,) * _nd)

    in_specs = [
        fixed((N, D)),                                 # x (flattened rows)
        fixed((S, S)),                                 # additive attention mask
        stacked((D, D)), stacked((1, D)),              # Wq, bq
        stacked((D, D)), stacked((1, D)),              # Wk, bk
        stacked((D, D)), stacked((1, D)),              # Wv, bv
        stacked((H, Dh, D)), stacked((1, D)),          # Wo (head-blocked), bo
        stacked((1, D)), stacked((1, D)),              # ln1 gamma, beta
        stacked((D, F)), stacked((1, F)),              # W1, b1
        stacked((F, D)), stacked((1, D)),              # W2, b2
        stacked((1, D)), stacked((1, D)),              # ln2 gamma, beta
    ]

    kernel = functools.partial(_encoder_stack_kernel, H, S)
    y2d = pl.pallas_call(
        kernel,
        out_shape=jax.ShapeDtypeStruct((N, D), jnp.float32),
        grid=(L,),
        in_specs=in_specs,
        out_specs=pl.BlockSpec((N, D), lambda l: (0, 0)),
        scratch_shapes=[
            pltpu.VMEM((N, D), jnp.float32),           # resident activations across L
            pltpu.VMEM((H, N, Dh), jnp.float32),       # attention context (head-major)
        ],
        compiler_params=pltpu.CompilerParams(
            dimension_semantics=("arbitrary",),        # layer axis is sequential
            vmem_limit_bytes=64 * 1024 * 1024,
        ),
    )(x2d, mask_bias,
      wq, bq, wk, bk, wv, bv, woh, bo,
      g1, be1, w1, bf1, w2, bf2, g2, be2)

    return y2d.reshape(B, S, D)


def init_encoder_params(key, num_layers, dim_embedding, dim_ff):
    """Per-layer params stacked along a leading L axis (for the fused layer grid)."""
    D, F = dim_embedding, dim_ff

    def lin(k, fan_in, fan_out):
        bound = 1.0 / math.sqrt(fan_in)                # nn.Linear default init
        kw, kb = jax.random.split(k)
        w = jax.random.uniform(kw, (num_layers, fan_in, fan_out), jnp.float32, -bound, bound)
        b = jax.random.uniform(kb, (num_layers, 1, fan_out), jnp.float32, -bound, bound)
        return w, b
    # NOTE: weights are stored (in_features, out_features) and used as x @ W; real
    # PyTorch nn.Linear weights ((out, in)) must be transposed before loading.

    ks = jax.random.split(key, 6)
    wq, bq = lin(ks[0], D, D)
    wk, bk = lin(ks[1], D, D)
    wv, bv = lin(ks[2], D, D)
    wo, bo = lin(ks[3], D, D)
    w1, bf1 = lin(ks[4], D, F)
    w2, bf2 = lin(ks[5], F, D)
    ones = jnp.ones((num_layers, 1, D), jnp.float32)
    zeros = jnp.zeros((num_layers, 1, D), jnp.float32)
    return dict(wq=wq, bq=bq, wk=wk, bk=bk, wv=wv, bv=bv, wo=wo, bo=bo,
                g1=ones, be1=zeros, w1=w1, bf1=bf1, w2=w2, bf2=bf2,
                g2=ones, be2=zeros)


if __name__ == "__main__":
    # small shapes consistent with the module
    B, S = 2, 8
    dim_embedding, num_layers, num_heads, dim_ff = 32, 2, 4, 64

    key = jax.random.PRNGKey(0)
    kx, kp = jax.random.split(key)
    x = jax.random.normal(kx, (B, S, dim_embedding), jnp.float32)
    params = init_encoder_params(kp, num_layers, dim_embedding, dim_ff)

    # TODO(synk): dropout (p=0.1) has no inference-mode effect and is omitted.
    out = encoder_forward(x, params, num_heads, mask=None)
    out = jax.block_until_ready(out)
    assert out.shape == (B, S, dim_embedding)
    assert bool(jnp.all(jnp.isfinite(out)))
    print("KERNEL_OK")
</pallas_src>

<mosaic_0001>
module attributes {stable_mosaic.version = 11 : i64} {
  func.func @_encoder_stack_kernel(%arg0: i32, %arg1: memref<16x32xf32, #tpu.memory_space<vmem>>, %arg2: memref<8x8xf32, #tpu.memory_space<vmem>>, %arg3: memref<1x32x32xbf16, #tpu.memory_space<vmem>>, %arg4: memref<1x1x32xf32, #tpu.memory_space<vmem>>, %arg5: memref<1x32x32xbf16, #tpu.memory_space<vmem>>, %arg6: memref<1x1x32xf32, #tpu.memory_space<vmem>>, %arg7: memref<1x32x32xbf16, #tpu.memory_space<vmem>>, %arg8: memref<1x1x32xf32, #tpu.memory_space<vmem>>, %arg9: memref<1x4x8x32xbf16, #tpu.memory_space<vmem>>, %arg10: memref<1x1x32xf32, #tpu.memory_space<vmem>>, %arg11: memref<1x1x32xf32, #tpu.memory_space<vmem>>, %arg12: memref<1x1x32xf32, #tpu.memory_space<vmem>>, %arg13: memref<1x32x64xbf16, #tpu.memory_space<vmem>>, %arg14: memref<1x1x64xf32, #tpu.memory_space<vmem>>, %arg15: memref<1x64x32xbf16, #tpu.memory_space<vmem>>, %arg16: memref<1x1x32xf32, #tpu.memory_space<vmem>>, %arg17: memref<1x1x32xf32, #tpu.memory_space<vmem>>, %arg18: memref<1x1x32xf32, #tpu.memory_space<vmem>>, %arg19: memref<16x32xf32, #tpu.memory_space<vmem>>, %arg20: memref<16x32xf32, #tpu.memory_space<vmem>>, %arg21: memref<4x16x8xf32, #tpu.memory_space<vmem>>) attributes {dimension_semantics = [#tpu.dimension_semantics<arbitrary>], iteration_bounds = array<i64: 2>, scalar_prefetch = 0 : i64, scratch_operands = 2 : i64, tpu.core_type = #tpu.core_type<tc>, window_params = [{pipeline_mode = #tpu.pipeline_mode<synchronous>, transform_indices = @transform_0, window_bounds = array<i64: 16, 32>}, {pipeline_mode = #tpu.pipeline_mode<synchronous>, transform_indices = @transform_1, window_bounds = array<i64: 8, 8>}, {transform_indices = @transform_2, window_bounds = array<i64: 1, 32, 32>}, {transform_indices = @transform_3, window_bounds = array<i64: 1, 1, 32>}, {transform_indices = @transform_4, window_bounds = array<i64: 1, 32, 32>}, {transform_indices = @transform_5, window_bounds = array<i64: 1, 1, 32>}, {transform_indices = @transform_6, window_bounds = array<i64: 1, 32, 32>}, {transform_indices = @transform_7, window_bounds = array<i64: 1, 1, 32>}, {transform_indices = @transform_8, window_bounds = array<i64: 1, 4, 8, 32>}, {transform_indices = @transform_9, window_bounds = array<i64: 1, 1, 32>}, {transform_indices = @transform_10, window_bounds = array<i64: 1, 1, 32>}, {transform_indices = @transform_11, window_bounds = array<i64: 1, 1, 32>}, {transform_indices = @transform_12, window_bounds = array<i64: 1, 32, 64>}, {transform_indices = @transform_13, window_bounds = array<i64: 1, 1, 64>}, {transform_indices = @transform_14, window_bounds = array<i64: 1, 64, 32>}, {transform_indices = @transform_15, window_bounds = array<i64: 1, 1, 32>}, {transform_indices = @transform_16, window_bounds = array<i64: 1, 1, 32>}, {transform_indices = @transform_17, window_bounds = array<i64: 1, 1, 32>}, {pipeline_mode = #tpu.pipeline_mode<synchronous>, transform_indices = @transform_18, window_bounds = array<i64: 16, 32>}]} {
    %c0_i32 = arith.constant 0 : i32
    %0 = arith.cmpi eq, %arg0, %c0_i32 : i32
    %1 = arith.extui %0 : i1 to i32
    %c0_i32_0 = arith.constant 0 : i32
    %2 = arith.cmpi ne, %1, %c0_i32_0 : i32
    scf.if %2 {
      %c0_91 = arith.constant 0 : index
      %c0_92 = arith.constant 0 : index
      %187 = vector.load %arg1[%c0_91, %c0_92] : memref<16x32xf32, #tpu.memory_space<vmem>>, vector<16x32xf32>
      %c0_93 = arith.constant 0 : index
      %c0_94 = arith.constant 0 : index
      %188 = vector.load %arg20[%c0_93, %c0_94] : memref<16x32xf32, #tpu.memory_space<vmem>>, vector<16x32xf32>
      tpu.vector_store %arg20[%c0_93, %c0_94], %187 {strides = array<i32>} : memref<16x32xf32, #tpu.memory_space<vmem>>, vector<16x32xf32>,
    } else {
    }
    %c0 = arith.constant 0 : index
    %c0_1 = arith.constant 0 : index
    %3 = vector.load %arg20[%c0, %c0_1] : memref<16x32xf32, #tpu.memory_space<vmem>>, vector<16x32xf32>
    %4 = arith.truncf %3 : vector<16x32xf32> to vector<16x32xbf16>
    %c0_2 = arith.constant 0 : index
    %c0_3 = arith.constant 0 : index
    %5 = vector.load %arg2[%c0_2, %c0_3] : memref<8x8xf32, #tpu.memory_space<vmem>>, vector<8x8xf32>
    %c0_4 = arith.constant 0 : index
    %c0_5 = arith.constant 0 : index
    %c0_6 = arith.constant 0 : index
    %6 = vector.load %arg3[%c0_4, %c0_5, %c0_6] : memref<1x32x32xbf16, #tpu.memory_space<vmem>>, vector<1x32x32xbf16>
    %7 = vector.shape_cast %6 : vector<1x32x32xbf16> to vector<32x32xbf16>
    %c0_7 = arith.constant 0 : index
    %c0_8 = arith.constant 0 : index
    %c0_9 = arith.constant 0 : index
    %8 = vector.load %arg5[%c0_7, %c0_8, %c0_9] : memref<1x32x32xbf16, #tpu.memory_space<vmem>>, vector<1x32x32xbf16>
    %9 = vector.shape_cast %8 : vector<1x32x32xbf16> to vector<32x32xbf16>
    %c0_10 = arith.constant 0 : index
    %c0_11 = arith.constant 0 : index
    %c0_12 = arith.constant 0 : index
    %10 = vector.load %arg7[%c0_10, %c0_11, %c0_12] : memref<1x32x32xbf16, #tpu.memory_space<vmem>>, vector<1x32x32xbf16>
    %11 = vector.shape_cast %10 : vector<1x32x32xbf16> to vector<32x32xbf16>
    %c0_13 = arith.constant 0 : index
    %c0_14 = arith.constant 0 : index
    %c0_15 = arith.constant 0 : index
    %c0_16 = arith.constant 0 : index
    %12 = vector.load %arg9[%c0_13, %c0_14, %c0_15, %c0_16] : memref<1x4x8x32xbf16, #tpu.memory_space<vmem>>, vector<1x4x8x32xbf16>
    %13 = vector.shape_cast %12 : vector<1x4x8x32xbf16> to vector<4x8x32xbf16>
    %c0_17 = arith.constant 0 : index
    %c0_18 = arith.constant 0 : index
    %c0_19 = arith.constant 0 : index
    %14 = vector.load %arg13[%c0_17, %c0_18, %c0_19] : memref<1x32x64xbf16, #tpu.memory_space<vmem>>, vector<1x32x64xbf16>
    %15 = vector.shape_cast %14 : vector<1x32x64xbf16> to vector<32x64xbf16>
    %c0_20 = arith.constant 0 : index
    %c0_21 = arith.constant 0 : index
    %c0_22 = arith.constant 0 : index
    %16 = vector.load %arg15[%c0_20, %c0_21, %c0_22] : memref<1x64x32xbf16, #tpu.memory_space<vmem>>, vector<1x64x32xbf16>
    %17 = vector.shape_cast %16 : vector<1x64x32xbf16> to vector<64x32xbf16>
    %c0_23 = arith.constant 0 : index
    %c0_24 = arith.constant 0 : index
    %c0_25 = arith.constant 0 : index
    %18 = vector.load %arg4[%c0_23, %c0_24, %c0_25] : memref<1x1x32xf32, #tpu.memory_space<vmem>>, vector<1x1x32xf32>
    %19 = vector.shape_cast %18 : vector<1x1x32xf32> to vector<1x32xf32>
    %c0_26 = arith.constant 0 : index
    %c0_27 = arith.constant 0 : index
    %c0_28 = arith.constant 0 : index
    %20 = vector.load %arg6[%c0_26, %c0_27, %c0_28] : memref<1x1x32xf32, #tpu.memory_space<vmem>>, vector<1x1x32xf32>
    %21 = vector.shape_cast %20 : vector<1x1x32xf32> to vector<1x32xf32>
    %c0_29 = arith.constant 0 : index
    %c0_30 = arith.constant 0 : index
    %c0_31 = arith.constant 0 : index
    %22 = vector.load %arg8[%c0_29, %c0_30, %c0_31] : memref<1x1x32xf32, #tpu.memory_space<vmem>>, vector<1x1x32xf32>
    %23 = vector.shape_cast %22 : vector<1x1x32xf32> to vector<1x32xf32>
    %c0_32 = arith.constant 0 : index
    %c0_33 = arith.constant 0 : index
    %c0_34 = arith.constant 0 : index
    %24 = vector.load %arg10[%c0_32, %c0_33, %c0_34] : memref<1x1x32xf32, #tpu.memory_space<vmem>>, vector<1x1x32xf32>
    %25 = vector.shape_cast %24 : vector<1x1x32xf32> to vector<1x32xf32>
    %c0_35 = arith.constant 0 : index
    %c0_36 = arith.constant 0 : index
    %c0_37 = arith.constant 0 : index
    %26 = vector.load %arg14[%c0_35, %c0_36, %c0_37] : memref<1x1x64xf32, #tpu.memory_space<vmem>>, vector<1x1x64xf32>
    %27 = vector.shape_cast %26 : vector<1x1x64xf32> to vector<1x64xf32>
    %c0_38 = arith.constant 0 : index
    %c0_39 = arith.constant 0 : index
    %c0_40 = arith.constant 0 : index
    %28 = vector.load %arg16[%c0_38, %c0_39, %c0_40] : memref<1x1x32xf32, #tpu.memory_space<vmem>>, vector<1x1x32xf32>
    %29 = vector.shape_cast %28 : vector<1x1x32xf32> to vector<1x32xf32>
    %c0_41 = arith.constant 0 : index
    %c0_42 = arith.constant 0 : index
    %c0_43 = arith.constant 0 : index
    %30 = vector.load %arg11[%c0_41, %c0_42, %c0_43] : memref<1x1x32xf32, #tpu.memory_space<vmem>>, vector<1x1x32xf32>
    %31 = vector.shape_cast %30 : vector<1x1x32xf32> to vector<1x32xf32>
    %c0_44 = arith.constant 0 : index
    %c0_45 = arith.constant 0 : index
    %c0_46 = arith.constant 0 : index
    %32 = vector.load %arg12[%c0_44, %c0_45, %c0_46] : memref<1x1x32xf32, #tpu.memory_space<vmem>>, vector<1x1x32xf32>
    %33 = vector.shape_cast %32 : vector<1x1x32xf32> to vector<1x32xf32>
    %c0_47 = arith.constant 0 : index
    %c0_48 = arith.constant 0 : index
    %c0_49 = arith.constant 0 : index
    %34 = vector.load %arg17[%c0_47, %c0_48, %c0_49] : memref<1x1x32xf32, #tpu.memory_space<vmem>>, vector<1x1x32xf32>
    %35 = vector.shape_cast %34 : vector<1x1x32xf32> to vector<1x32xf32>
    %c0_50 = arith.constant 0 : index
    %c0_51 = arith.constant 0 : index
    %c0_52 = arith.constant 0 : index
    %36 = vector.load %arg18[%c0_50, %c0_51, %c0_52] : memref<1x1x32xf32, #tpu.memory_space<vmem>>, vector<1x1x32xf32>
    %37 = vector.shape_cast %36 : vector<1x1x32xf32> to vector<1x32xf32>
    %cst = arith.constant dense<0.000000e+00> : vector<16x32xf32>
    %38 = tpu.matmul %4, %7, %cst {dimension_numbers = #tpu.dot_dimension_numbers<[1], [0], [0], [1], [0, 0, 1, 1], [], []>} : vector<16x32xbf16>, vector<32x32xbf16>, vector<16x32xf32> -> vector<16x32xf32>
    %39 = vector.broadcast %19 : vector<1x32xf32> to vector<16x32xf32>
    %40 = arith.addf %38, %39 : vector<16x32xf32>
    %cst_53 = arith.constant dense<0.000000e+00> : vector<16x32xf32>
    %41 = tpu.matmul %4, %9, %cst_53 {dimension_numbers = #tpu.dot_dimension_numbers<[1], [0], [0], [1], [0, 0, 1, 1], [], []>} : vector<16x32xbf16>, vector<32x32xbf16>, vector<16x32xf32> -> vector<16x32xf32>
    %42 = vector.broadcast %21 : vector<1x32xf32> to vector<16x32xf32>
    %43 = arith.addf %41, %42 : vector<16x32xf32>
    %cst_54 = arith.constant dense<0.000000e+00> : vector<16x32xf32>
    %44 = tpu.matmul %4, %11, %cst_54 {dimension_numbers = #tpu.dot_dimension_numbers<[1], [0], [0], [1], [0, 0, 1, 1], [], []>} : vector<16x32xbf16>, vector<32x32xbf16>, vector<16x32xf32> -> vector<16x32xf32>
    %45 = vector.broadcast %23 : vector<1x32xf32> to vector<16x32xf32>
    %46 = arith.addf %44, %45 : vector<16x32xf32>
    %47 = vector.extract_strided_slice %40 {offsets = [0, 0], sizes = [16, 8], strides = [1, 1]} : vector<16x32xf32> to vector<16x8xf32>
    %48 = vector.extract_strided_slice %40 {offsets = [0, 8], sizes = [16, 8], strides = [1, 1]} : vector<16x32xf32> to vector<16x8xf32>
    %49 = vector.extract_strided_slice %40 {offsets = [0, 16], sizes = [16, 8], strides = [1, 1]} : vector<16x32xf32> to vector<16x8xf32>
    %50 = vector.extract_strided_slice %40 {offsets = [0, 24], sizes = [16, 8], strides = [1, 1]} : vector<16x32xf32> to vector<16x8xf32>
    %51 = vector.shape_cast %47 : vector<16x8xf32> to vector<1x16x8xf32>
    %52 = vector.shape_cast %48 : vector<16x8xf32> to vector<1x16x8xf32>
    %53 = vector.shape_cast %49 : vector<16x8xf32> to vector<1x16x8xf32>
    %54 = vector.shape_cast %50 : vector<16x8xf32> to vector<1x16x8xf32>
    %55 = tpu.concatenate %51, %52, %53, %54 in 0 : vector<1x16x8xf32>, vector<1x16x8xf32>, vector<1x16x8xf32>, vector<1x16x8xf32> -> vector<4x16x8xf32>
    %56 = arith.truncf %55 : vector<4x16x8xf32> to vector<4x16x8xbf16>
    %57 = vector.extract_strided_slice %43 {offsets = [0, 0], sizes = [16, 8], strides = [1, 1]} : vector<16x32xf32> to vector<16x8xf32>
    %58 = vector.extract_strided_slice %43 {offsets = [0, 8], sizes = [16, 8], strides = [1, 1]} : vector<16x32xf32> to vector<16x8xf32>
    %59 = vector.extract_strided_slice %43 {offsets = [0, 16], sizes = [16, 8], strides = [1, 1]} : vector<16x32xf32> to vector<16x8xf32>
    %60 = vector.extract_strided_slice %43 {offsets = [0, 24], sizes = [16, 8], strides = [1, 1]} : vector<16x32xf32> to vector<16x8xf32>
    %61 = vector.shape_cast %57 : vector<16x8xf32> to vector<1x16x8xf32>
    %62 = vector.shape_cast %58 : vector<16x8xf32> to vector<1x16x8xf32>
    %63 = vector.shape_cast %59 : vector<16x8xf32> to vector<1x16x8xf32>
    %64 = vector.shape_cast %60 : vector<16x8xf32> to vector<1x16x8xf32>
    %65 = tpu.concatenate %61, %62, %63, %64 in 0 : vector<1x16x8xf32>, vector<1x16x8xf32>, vector<1x16x8xf32>, vector<1x16x8xf32> -> vector<4x16x8xf32>
    %66 = arith.truncf %65 : vector<4x16x8xf32> to vector<4x16x8xbf16>
    %67 = vector.extract_strided_slice %46 {offsets = [0, 0], sizes = [16, 8], strides = [1, 1]} : vector<16x32xf32> to vector<16x8xf32>
    %68 = vector.extract_strided_slice %46 {offsets = [0, 8], sizes = [16, 8], strides = [1, 1]} : vector<16x32xf32> to vector<16x8xf32>
    %69 = vector.extract_strided_slice %46 {offsets = [0, 16], sizes = [16, 8], strides = [1, 1]} : vector<16x32xf32> to vector<16x8xf32>
    %70 = vector.extract_strided_slice %46 {offsets = [0, 24], sizes = [16, 8], strides = [1, 1]} : vector<16x32xf32> to vector<16x8xf32>
    %71 = vector.shape_cast %67 : vector<16x8xf32> to vector<1x16x8xf32>
    %72 = vector.shape_cast %68 : vector<16x8xf32> to vector<1x16x8xf32>
    %73 = vector.shape_cast %69 : vector<16x8xf32> to vector<1x16x8xf32>
    %74 = vector.shape_cast %70 : vector<16x8xf32> to vector<1x16x8xf32>
    %75 = tpu.concatenate %71, %72, %73, %74 in 0 : vector<1x16x8xf32>, vector<1x16x8xf32>, vector<1x16x8xf32>, vector<1x16x8xf32> -> vector<4x16x8xf32>
    %76 = arith.truncf %75 : vector<4x16x8xf32> to vector<4x16x8xbf16>
    %77 = vector.extract_strided_slice %56 {offsets = [0, 0, 0], sizes = [4, 8, 8], strides = [1, 1, 1]} : vector<4x16x8xbf16> to vector<4x8x8xbf16>
    %78 = vector.extract_strided_slice %66 {offsets = [0, 0, 0], sizes = [4, 8, 8], strides = [1, 1, 1]} : vector<4x16x8xbf16> to vector<4x8x8xbf16>
    %79 = vector.extract_strided_slice %76 {offsets = [0, 0, 0], sizes = [4, 8, 8], strides = [1, 1, 1]} : vector<4x16x8xbf16> to vector<4x8x8xbf16>
    "tpu.trace_start"() <{level = 10 : i32, message = "hqd,hkd->hqk"}> : () -> ()
    %cst_55 = arith.constant dense<0.000000e+00> : vector<4x8x8xf32>
    %80 = tpu.matmul %77, %78, %cst_55 {dimension_numbers = #tpu.dot_dimension_numbers<[2], [2], [1], [1], [0, 0, 0, 1, 1, 1], [0], [0]>} : vector<4x8x8xbf16>, vector<4x8x8xbf16>, vector<4x8x8xf32> -> vector<4x8x8xf32>
    "tpu.trace_stop"() : () -> ()
    %cst_56 = arith.constant 0.353553385 : f32
    %81 = vector.broadcast %cst_56 : f32 to vector<4x8x8xf32>
    %82 = arith.mulf %80, %81 : vector<4x8x8xf32>
    %83 = vector.shape_cast %5 : vector<8x8xf32> to vector<1x8x8xf32>
    %84 = vector.broadcast %83 : vector<1x8x8xf32> to vector<4x8x8xf32>
    %85 = arith.addf %82, %84 : vector<4x8x8xf32>
    %cst_57 = arith.constant dense<0xFF800000> : vector<4x8xf32>
    %86 = vector.multi_reduction <maximumf>, %85, %cst_57 [2] : vector<4x8x8xf32> to vector<4x8xf32>
    %87 = vector.shape_cast %86 : vector<4x8xf32> to vector<4x8x1xf32>
    %88 = vector.broadcast %87 : vector<4x8x1xf32> to vector<4x8x8xf32>
    %89 = arith.subf %85, %88 : vector<4x8x8xf32>
    %90 = math.exp %89 : vector<4x8x8xf32>
    %cst_58 = arith.constant dense<0.000000e+00> : vector<4x8xf32>
    %91 = vector.multi_reduction <add>, %90, %cst_58 [2] : vector<4x8x8xf32> to vector<4x8xf32>
    %92 = vector.shape_cast %91 : vector<4x8xf32> to vector<4x8x1xf32>
    %93 = tpu.reciprocal %92 {approx = true} : vector<4x8x1xf32> -> vector<4x8x1xf32>
    %94 = vector.broadcast %93 : vector<4x8x1xf32> to vector<4x8x8xf32>
    %95 = arith.mulf %90, %94 : vector<4x8x8xf32>
    %96 = arith.truncf %95 : vector<4x8x8xf32> to vector<4x8x8xbf16>
    "tpu.trace_start"() <{level = 10 : i32, message = "hqk,hkd->hqd"}> : () -> ()
    %cst_59 = arith.constant dense<0.000000e+00> : vector<4x8x8xf32>
    %97 = tpu.matmul %96, %79, %cst_59 {dimension_numbers = #tpu.dot_dimension_numbers<[2], [1], [1], [2], [0, 0, 0, 1, 1, 2], [0], [0]>} : vector<4x8x8xbf16>, vector<4x8x8xbf16>, vector<4x8x8xf32> -> vector<4x8x8xf32>
    "tpu.trace_stop"() : () -> ()
    %c0_60 = arith.constant 0 : index
    %c0_61 = arith.constant 0 : index
    %c0_62 = arith.constant 0 : index
    %98 = vector.load %arg21[%c0_60, %c0_61, %c0_62] : memref<4x16x8xf32, #tpu.memory_space<vmem>>, vector<4x8x8xf32>
    tpu.vector_store %arg21[%c0_60, %c0_61, %c0_62], %97 {strides = array<i32>} : memref<4x16x8xf32, #tpu.memory_space<vmem>>, vector<4x8x8xf32>,
    %99 = vector.extract_strided_slice %56 {offsets = [0, 8, 0], sizes = [4, 8, 8], strides = [1, 1, 1]} : vector<4x16x8xbf16> to vector<4x8x8xbf16>
    %100 = vector.extract_strided_slice %66 {offsets = [0, 8, 0], sizes = [4, 8, 8], strides = [1, 1, 1]} : vector<4x16x8xbf16> to vector<4x8x8xbf16>
    %101 = vector.extract_strided_slice %76 {offsets = [0, 8, 0], sizes = [4, 8, 8], strides = [1, 1, 1]} : vector<4x16x8xbf16> to vector<4x8x8xbf16>
    "tpu.trace_start"() <{level = 10 : i32, message = "hqd,hkd->hqk"}> : () -> ()
    %cst_63 = arith.constant dense<0.000000e+00> : vector<4x8x8xf32>
    %102 = tpu.matmul %99, %100, %cst_63 {dimension_numbers = #tpu.dot_dimension_numbers<[2], [2], [1], [1], [0, 0, 0, 1, 1, 1], [0], [0]>} : vector<4x8x8xbf16>, vector<4x8x8xbf16>, vector<4x8x8xf32> -> vector<4x8x8xf32>
    "tpu.trace_stop"() : () -> ()
    %cst_64 = arith.constant 0.353553385 : f32
    %103 = vector.broadcast %cst_64 : f32 to vector<4x8x8xf32>
    %104 = arith.mulf %102, %103 : vector<4x8x8xf32>
    %105 = vector.shape_cast %5 : vector<8x8xf32> to vector<1x8x8xf32>
    %106 = vector.broadcast %105 : vector<1x8x8xf32> to vector<4x8x8xf32>
    %107 = arith.addf %104, %106 : vector<4x8x8xf32>
    %cst_65 = arith.constant dense<0xFF800000> : vector<4x8xf32>
    %108 = vector.multi_reduction <maximumf>, %107, %cst_65 [2] : vector<4x8x8xf32> to vector<4x8xf32>
    %109 = vector.shape_cast %108 : vector<4x8xf32> to vector<4x8x1xf32>
    %110 = vector.broadcast %109 : vector<4x8x1xf32> to vector<4x8x8xf32>
    %111 = arith.subf %107, %110 : vector<4x8x8xf32>
    %112 = math.exp %111 : vector<4x8x8xf32>
    %cst_66 = arith.constant dense<0.000000e+00> : vector<4x8xf32>
    %113 = vector.multi_reduction <add>, %112, %cst_66 [2] : vector<4x8x8xf32> to vector<4x8xf32>
    %114 = vector.shape_cast %113 : vector<4x8xf32> to vector<4x8x1xf32>
    %115 = tpu.reciprocal %114 {approx = true} : vector<4x8x1xf32> -> vector<4x8x1xf32>
    %116 = vector.broadcast %115 : vector<4x8x1xf32> to vector<4x8x8xf32>
    %117 = arith.mulf %112, %116 : vector<4x8x8xf32>
    %118 = arith.truncf %117 : vector<4x8x8xf32> to vector<4x8x8xbf16>
    "tpu.trace_start"() <{level = 10 : i32, message = "hqk,hkd->hqd"}> : () -> ()
    %cst_67 = arith.constant dense<0.000000e+00> : vector<4x8x8xf32>
    %119 = tpu.matmul %118, %101, %cst_67 {dimension_numbers = #tpu.dot_dimension_numbers<[2], [1], [1], [2], [0, 0, 0, 1, 1, 2], [0], [0]>} : vector<4x8x8xbf16>, vector<4x8x8xbf16>, vector<4x8x8xf32> -> vector<4x8x8xf32>
    "tpu.trace_stop"() : () -> ()
    %c0_68 = arith.constant 0 : index
    %c8 = arith.constant 8 : index
    %c0_69 = arith.constant 0 : index
    %120 = vector.load %arg21[%c0_68, %c8, %c0_69] : memref<4x16x8xf32, #tpu.memory_space<vmem>>, vector<4x8x8xf32>
    tpu.vector_store %arg21[%c0_68, %c8, %c0_69], %119 {strides = array<i32>} : memref<4x16x8xf32, #tpu.memory_space<vmem>>, vector<4x8x8xf32>,
    %c0_70 = arith.constant 0 : index
    %c0_71 = arith.constant 0 : index
    %c0_72 = arith.constant 0 : index
    %121 = vector.load %arg21[%c0_70, %c0_71, %c0_72] : memref<4x16x8xf32, #tpu.memory_space<vmem>>, vector<4x16x8xf32>
    %122 = arith.truncf %121 : vector<4x16x8xf32> to vector<4x16x8xbf16>
    "tpu.trace_start"() <{level = 10 : i32, message = "hnd,hde->hne"}> : () -> ()
    %cst_73 = arith.constant dense<0.000000e+00> : vector<4x16x32xf32>
    %123 = tpu.matmul %122, %13, %cst_73 {dimension_numbers = #tpu.dot_dimension_numbers<[2], [1], [1], [2], [0, 0, 0, 1, 1, 2], [0], [0]>} : vector<4x16x8xbf16>, vector<4x8x32xbf16>, vector<4x16x32xf32> -> vector<4x16x32xf32>
    "tpu.trace_stop"() : () -> ()
    %cst_74 = arith.constant dense<0.000000e+00> : vector<16x32xf32>
    %124 = vector.multi_reduction <add>, %123, %cst_74 [0] : vector<4x16x32xf32> to vector<16x32xf32>
    %125 = vector.broadcast %25 : vector<1x32xf32> to vector<16x32xf32>
    %126 = arith.addf %124, %125 : vector<16x32xf32>
    %127 = arith.addf %3, %126 : vector<16x32xf32>
    %cst_75 = arith.constant dense<0.000000e+00> : vector<16xf32>
    %128 = vector.multi_reduction <add>, %127, %cst_75 [1] : vector<16x32xf32> to vector<16xf32>
    %129 = vector.shape_cast %128 : vector<16xf32> to vector<16x1xf32>
    %cst_76 = arith.constant 3.200000e+01 : f32
    %130 = vector.broadcast %cst_76 : f32 to vector<16x1xf32>
    %131 = arith.divf %129, %130 : vector<16x1xf32>
    %132 = vector.broadcast %131 : vector<16x1xf32> to vector<16x32xf32>
    %133 = arith.subf %127, %132 : vector<16x32xf32>
    %134 = arith.mulf %133, %133 : vector<16x32xf32>
    %cst_77 = arith.constant dense<0.000000e+00> : vector<16xf32>
    %135 = vector.multi_reduction <add>, %134, %cst_77 [1] : vector<16x32xf32> to vector<16xf32>
    %136 = vector.shape_cast %135 : vector<16xf32> to vector<16x1xf32>
    %cst_78 = arith.constant 3.200000e+01 : f32
    %137 = vector.broadcast %cst_78 : f32 to vector<16x1xf32>
    %138 = arith.divf %136, %137 : vector<16x1xf32>
    %139 = vector.broadcast %131 : vector<16x1xf32> to vector<16x32xf32>
    %140 = arith.subf %127, %139 : vector<16x32xf32>
    %cst_79 = arith.constant 9.99999974E-6 : f32
    %141 = vector.broadcast %cst_79 : f32 to vector<16x1xf32>
    %142 = arith.addf %138, %141 : vector<16x1xf32>
    %143 = math.rsqrt %142 : vector<16x1xf32>
    %144 = vector.broadcast %143 : vector<16x1xf32> to vector<16x32xf32>
    %145 = arith.mulf %140, %144 : vector<16x32xf32>
    %146 = vector.broadcast %31 : vector<1x32xf32> to vector<16x32xf32>
    %147 = arith.mulf %145, %146 : vector<16x32xf32>
    %148 = vector.broadcast %33 : vector<1x32xf32> to vector<16x32xf32>
    %149 = arith.addf %147, %148 : vector<16x32xf32>
    %150 = arith.truncf %149 : vector<16x32xf32> to vector<16x32xbf16>
    %cst_80 = arith.constant dense<0.000000e+00> : vector<16x64xf32>
    %151 = tpu.matmul %150, %15, %cst_80 {dimension_numbers = #tpu.dot_dimension_numbers<[1], [0], [0], [1], [0, 0, 1, 1], [], []>} : vector<16x32xbf16>, vector<32x64xbf16>, vector<16x64xf32> -> vector<16x64xf32>
    %152 = vector.broadcast %27 : vector<1x64xf32> to vector<16x64xf32>
    %153 = arith.addf %151, %152 : vector<16x64xf32>
    %cst_81 = arith.constant 0.000000e+00 : f32
    %154 = vector.broadcast %cst_81 : f32 to vector<16x64xf32>
    %155 = arith.maximumf %153, %154 : vector<16x64xf32>
    %156 = arith.truncf %155 : vector<16x64xf32> to vector<16x64xbf16>
    %cst_82 = arith.constant dense<0.000000e+00> : vector<16x32xf32>
    %157 = tpu.matmul %156, %17, %cst_82 {dimension_numbers = #tpu.dot_dimension_numbers<[1], [0], [0], [1], [0, 0, 1, 1], [], []>} : vector<16x64xbf16>, vector<64x32xbf16>, vector<16x32xf32> -> vector<16x32xf32>
    %158 = vector.broadcast %29 : vector<1x32xf32> to vector<16x32xf32>
    %159 = arith.addf %157, %158 : vector<16x32xf32>
    %160 = arith.addf %149, %159 : vector<16x32xf32>
    %cst_83 = arith.constant dense<0.000000e+00> : vector<16xf32>
    %161 = vector.multi_reduction <add>, %160, %cst_83 [1] : vector<16x32xf32> to vector<16xf32>
    %162 = vector.shape_cast %161 : vector<16xf32> to vector<16x1xf32>
    %cst_84 = arith.constant 3.200000e+01 : f32
    %163 = vector.broadcast %cst_84 : f32 to vector<16x1xf32>
    %164 = arith.divf %162, %163 : vector<16x1xf32>
    %165 = vector.broadcast %164 : vector<16x1xf32> to vector<16x32xf32>
    %166 = arith.subf %160, %165 : vector<16x32xf32>
    %167 = arith.mulf %166, %166 : vector<16x32xf32>
    %cst_85 = arith.constant dense<0.000000e+00> : vector<16xf32>
    %168 = vector.multi_reduction <add>, %167, %cst_85 [1] : vector<16x32xf32> to vector<16xf32>
    %169 = vector.shape_cast %168 : vector<16xf32> to vector<16x1xf32>
    %cst_86 = arith.constant 3.200000e+01 : f32
    %170 = vector.broadcast %cst_86 : f32 to vector<16x1xf32>
    %171 = arith.divf %169, %170 : vector<16x1xf32>
    %172 = vector.broadcast %164 : vector<16x1xf32> to vector<16x32xf32>
    %173 = arith.subf %160, %172 : vector<16x32xf32>
    %cst_87 = arith.constant 9.99999974E-6 : f32
    %174 = vector.broadcast %cst_87 : f32 to vector<16x1xf32>
    %175 = arith.addf %171, %174 : vector<16x1xf32>
    %176 = math.rsqrt %175 : vector<16x1xf32>
    %177 = vector.broadcast %176 : vector<16x1xf32> to vector<16x32xf32>
    %178 = arith.mulf %173, %177 : vector<16x32xf32>
    %179 = vector.broadcast %35 : vector<1x32xf32> to vector<16x32xf32>
    %180 = arith.mulf %178, %179 : vector<16x32xf32>
    %181 = vector.broadcast %37 : vector<1x32xf32> to vector<16x32xf32>
    %182 = arith.addf %180, %181 : vector<16x32xf32>
    %c0_88 = arith.constant 0 : index
    %c0_89 = arith.constant 0 : index
    %183 = vector.load %arg20[%c0_88, %c0_89] : memref<16x32xf32, #tpu.memory_space<vmem>>, vector<16x32xf32>
    tpu.vector_store %arg20[%c0_88, %c0_89], %182 {strides = array<i32>} : memref<16x32xf32, #tpu.memory_space<vmem>>, vector<16x32xf32>,
    %c1_i32 = arith.constant 1 : i32
    %184 = arith.cmpi eq, %arg0, %c1_i32 : i32
    %185 = arith.extui %184 : i1 to i32
    %c0_i32_90 = arith.constant 0 : i32
    %186 = arith.cmpi ne, %185, %c0_i32_90 : i32
    scf.if %186 {
      %c0_91 = arith.constant 0 : index
      %c0_92 = arith.constant 0 : index
      %187 = vector.load %arg19[%c0_91, %c0_92] : memref<16x32xf32, #tpu.memory_space<vmem>>, vector<16x32xf32>
      tpu.vector_store %arg19[%c0_91, %c0_92], %182 {strides = array<i32>} : memref<16x32xf32, #tpu.memory_space<vmem>>, vector<16x32xf32>,
    } else {
    }
    return
  }
  func.func @transform_0(%arg0: i32) -> (i32, i32) {
    %c0_i32 = arith.constant 0 : i32
    %c0_i32_0 = arith.constant 0 : i32
    %c0_i32_1 = arith.constant 0 : i32
    return %c0_i32, %c0_i32_0 : i32, i32
  }
  func.func @transform_1(%arg0: i32) -> (i32, i32) {
    %c0_i32 = arith.constant 0 : i32
    %c0_i32_0 = arith.constant 0 : i32
    %c0_i32_1 = arith.constant 0 : i32
    return %c0_i32, %c0_i32_0 : i32, i32
  }
  func.func @transform_2(%arg0: i32) -> (i32, i32, i32) {
    %c0_i32 = arith.constant 0 : i32
    %c0_i32_0 = arith.constant 0 : i32
    %c0_i32_1 = arith.constant 0 : i32
    return %arg0, %c0_i32, %c0_i32_0 : i32, i32, i32
  }
  func.func @transform_3(%arg0: i32) -> (i32, i32, i32) {
    %c0_i32 = arith.constant 0 : i32
    %c0_i32_0 = arith.constant 0 : i32
    %c0_i32_1 = arith.constant 0 : i32
    return %arg0, %c0_i32, %c0_i32_0 : i32, i32, i32
  }
  func.func @transform_4(%arg0: i32) -> (i32, i32, i32) {
    %c0_i32 = arith.constant 0 : i32
    %c0_i32_0 = arith.constant 0 : i32
    %c0_i32_1 = arith.constant 0 : i32
    return %arg0, %c0_i32, %c0_i32_0 : i32, i32, i32
  }
  func.func @transform_5(%arg0: i32) -> (i32, i32, i32) {
    %c0_i32 = arith.constant 0 : i32
    %c0_i32_0 = arith.constant 0 : i32
    %c0_i32_1 = arith.constant 0 : i32
    return %arg0, %c0_i32, %c0_i32_0 : i32, i32, i32
  }
  func.func @transform_6(%arg0: i32) -> (i32, i32, i32) {
    %c0_i32 = arith.constant 0 : i32
    %c0_i32_0 = arith.constant 0 : i32
    %c0_i32_1 = arith.constant 0 : i32
    return %arg0, %c0_i32, %c0_i32_0 : i32, i32, i32
  }
  func.func @transform_7(%arg0: i32) -> (i32, i32, i32) {
    %c0_i32 = arith.constant 0 : i32
    %c0_i32_0 = arith.constant 0 : i32
    %c0_i32_1 = arith.constant 0 : i32
    return %arg0, %c0_i32, %c0_i32_0 : i32, i32, i32
  }
  func.func @transform_8(%arg0: i32) -> (i32, i32, i32, i32) {
    %c0_i32 = arith.constant 0 : i32
    %c0_i32_0 = arith.constant 0 : i32
    %c0_i32_1 = arith.constant 0 : i32
    %c0_i32_2 = arith.constant 0 : i32
    return %arg0, %c0_i32, %c0_i32_0, %c0_i32_1 : i32, i32, i32, i32
  }
  func.func @transform_9(%arg0: i32) -> (i32, i32, i32) {
    %c0_i32 = arith.constant 0 : i32
    %c0_i32_0 = arith.constant 0 : i32
    %c0_i32_1 = arith.constant 0 : i32
    return %arg0, %c0_i32, %c0_i32_0 : i32, i32, i32
  }
  func.func @transform_10(%arg0: i32) -> (i32, i32, i32) {
    %c0_i32 = arith.constant 0 : i32
    %c0_i32_0 = arith.constant 0 : i32
    %c0_i32_1 = arith.constant 0 : i32
    return %arg0, %c0_i32, %c0_i32_0 : i32, i32, i32
  }
  func.func @transform_11(%arg0: i32) -> (i32, i32, i32) {
    %c0_i32 = arith.constant 0 : i32
    %c0_i32_0 = arith.constant 0 : i32
    %c0_i32_1 = arith.constant 0 : i32
    return %arg0, %c0_i32, %c0_i32_0 : i32, i32, i32
  }
  func.func @transform_12(%arg0: i32) -> (i32, i32, i32) {
    %c0_i32 = arith.constant 0 : i32
    %c0_i32_0 = arith.constant 0 : i32
    %c0_i32_1 = arith.constant 0 : i32
    return %arg0, %c0_i32, %c0_i32_0 : i32, i32, i32
  }
  func.func @transform_13(%arg0: i32) -> (i32, i32, i32) {
    %c0_i32 = arith.constant 0 : i32
    %c0_i32_0 = arith.constant 0 : i32
    %c0_i32_1 = arith.constant 0 : i32
    return %arg0, %c0_i32, %c0_i32_0 : i32, i32, i32
  }
  func.func @transform_14(%arg0: i32) -> (i32, i32, i32) {
    %c0_i32 = arith.constant 0 : i32
    %c0_i32_0 = arith.constant 0 : i32
    %c0_i32_1 = arith.constant 0 : i32
    return %arg0, %c0_i32, %c0_i32_0 : i32, i32, i32
  }
  func.func @transform_15(%arg0: i32) -> (i32, i32, i32) {
    %c0_i32 = arith.constant 0 : i32
    %c0_i32_0 = arith.constant 0 : i32
    %c0_i32_1 = arith.constant 0 : i32
    return %arg0, %c0_i32, %c0_i32_0 : i32, i32, i32
  }
  func.func @transform_16(%arg0: i32) -> (i32, i32, i32) {
    %c0_i32 = arith.constant 0 : i32
    %c0_i32_0 = arith.constant 0 : i32
    %c0_i32_1 = arith.constant 0 : i32
    return %arg0, %c0_i32, %c0_i32_0 : i32, i32, i32
  }
  func.func @transform_17(%arg0: i32) -> (i32, i32, i32) {
    %c0_i32 = arith.constant 0 : i32
    %c0_i32_0 = arith.constant 0 : i32
    %c0_i32_1 = arith.constant 0 : i32
    return %arg0, %c0_i32, %c0_i32_0 : i32, i32, i32
  }
  func.func @transform_18(%arg0: i32) -> (i32, i32) {
    %c0_i32 = arith.constant 0 : i32
    %c0_i32_0 = arith.constant 0 : i32
    %c0_i32_1 = arith.constant 0 : i32
    return %c0_i32, %c0_i32_0 : i32, i32
  }
}

</mosaic_0001>

<bundles_post_ra>
// kernel: tpu_custom_call.1
= control target key start
LH: loop header
LB: loop body
LE: loop exit
PB: predicated region body
PF: predicated region fallthrough
CT: control target
= control target key end

     0   :  { %s4112_s0 = inlined_call_operand.hbm [shape: f32[16,32], index: 0, kind: input, shape index: {}]   ;;  %s4113_s1 = inlined_call_operand.hbm [shape: f32[8,8], index: 1, kind: input, shape index: {}]   ;;  %s4114_s2 = inlined_call_operand.vmem [shape: bf16[2,32,32], index: 2, kind: input, shape index: {}]   ;;  %s4115_s3 = inlined_call_operand.vmem [shape: f32[2,1,32], index: 3, kind: input, shape index: {}]   ;;  %s4116_s4 = inlined_call_operand.vmem [shape: bf16[2,32,32], index: 4, kind: input, shape index: {}]   ;;  %s4117_s5 = inlined_call_operand.vmem [shape: f32[2,1,32], index: 5, kind: input, shape index: {}]   ;;  %s4118_s6 = inlined_call_operand.vmem [shape: bf16[2,32,32], index: 6, kind: input, shape index: {}]   ;;  %s4119_s7 = inlined_call_operand.vmem [shape: f32[2,1,32], index: 7, kind: input, shape index: {}]   ;;  %s4120_s8 = inlined_call_operand.hbm [shape: bf16[2,4,8,32], index: 8, kind: input, shape index: {}]   ;;  %s4121_s9 = inlined_call_operand.vmem [shape: f32[2,1,32], index: 9, kind: input, shape index: {}]   ;;  %s4122_s10 = inlined_call_operand.vmem [shape: f32[2,1,32], index: 10, kind: input, shape index: {}]   ;;  %s4123_s11 = inlined_call_operand.vmem [shape: f32[2,1,32], index: 11, kind: input, shape index: {}]   ;;  %s4124_s12 = inlined_call_operand.hbm [shape: bf16[2,32,64], index: 12, kind: input, shape index: {}]   ;;  %s4125_s13 = inlined_call_operand.vmem [shape: f32[2,1,64], index: 13, kind: input, shape index: {}]   ;;  %s4126_s14 = inlined_call_operand.vmem [shape: bf16[2,64,32], index: 14, kind: input, shape index: {}]   ;;  %s4127_s15 = inlined_call_operand.vmem [shape: f32[2,1,32], index: 15, kind: input, shape index: {}]   ;;  %s4128_s16 = inlined_call_operand.vmem [shape: f32[2,1,32], index: 16, kind: input, shape index: {}]   ;;  %s4129_s17 = inlined_call_operand.vmem [shape: f32[2,1,32], index: 17, kind: input, shape index: {}]   ;;  %s4130_s18 = inlined_call_operand.hbm [shape: f32[16,32], index: 18, kind: output, shape index: {}]  }
   0x1   :  { %4139 = sst [smem:[#allocation20_spill]] %s4112_s0 }
   0x2   :  { %4140 = sst [smem:[#allocation21_spill]] %s4113_s1 }
   0x3   :  { %4141 = sst [smem:[#allocation22_spill]] %s4114_s2 }
   0x4   :  { %4142 = sst [smem:[#allocation23_spill]] %s4116_s4 }
   0x5   :  { %4143 = sst [smem:[#allocation24_spill]] %s4118_s6 }
   0x6   :  { %4144 = sst [smem:[#allocation25_spill]] %s4120_s8 }
   0x7   :  { %4145 = sst [smem:[#allocation26_spill]] %s4121_s9 }
   0x8   :  { %4146 = sst [smem:[#allocation27_spill]] %s4122_s10 }
   0x9   :  { %4147 = sst [smem:[#allocation28_spill]] %s4123_s11 }
   0xa   :  { %4148 = sst [smem:[#allocation29_spill]] %s4124_s12 }
   0xb   :  { %4149 = sst [smem:[#allocation30_spill]] %s4125_s13 }
   0xc   :  { %4150 = sst [smem:[#allocation31_spill]] %s4126_s14 }
   0xd   :  { %4151 = sst [smem:[#allocation32_spill]] %s4127_s15 }
   0xe   :  { %4152 = sst [smem:[#allocation33_spill]] %s4128_s16 }
   0xf   :  { %4153 = sst [smem:[#allocation34_spill]] %s4129_s17 }
  0x10   :  { %4154 = sst [smem:[#allocation35_spill]] %s4130_s18 }
  0x11   :  { %23 = vsyncpa [#allocation5], 0 }
  0x12   :  { %24 = vsyncpa [#allocation8], 0 }
  0x13   :  { %25 = vsyncpa [#allocation6], 0  ;;  %s3522_s27 = smov 0   ;;  %s3524_s28 = smov 0  }
  0x14   :  { %s3526_s29 = smov 0   ;;  %s3528_s30 = smov 0  }
  0x15 LB: > { %4155 = sst [smem:[#allocation16_spill]] %s3401_s28  ;;  %s3541_s0 = sadd.s32 4294967295, %s3409_s30   ;;  %s3409_s30 = sphi %s3528_s30, %s4201_s30   ;;  %s3405_s29 = sphi %s3526_s29, %s4204_s29   ;;  %s3401_s28 = sphi %s3524_s28, %s4203_s28   ;;  %s3397_s27 = sphi %s3522_s27, %s4202_s27  }
  0x16   : > { %4156 = sst [smem:[#allocation17_spill]] %s3405_s29  ;;  %s3544_s19 = sadd.s32 1, %s3409_s30  }
  0x17   : > { %4157 = sst [smem:[#allocation18_spill]] %s3544_s19  ;;  %s233_s1 = ssub.s32 %s3409_s30, %s3544_s19 }
  0x18   : > { %s236_s20 = sadd.s32 1, %s3405_s29  ;;  %p234_p0 = scmp.eq.s32.totalorder %s233_s1, 0 }
  0x19   : > { %p243_p1 = scmp.ne.s32.totalorder %s3405_s29, %s3401_s28  ;;  %p244_p2 = scmp.eq.s32.totalorder %s3409_s30, 0 }
  0x1a   : > { %p249_p3 = scmp.ne.s32.totalorder %s3401_s28, %s3397_s27  ;;  %p4131_p5 = scmp.eq.s32.totalorder %s3541_s0, 0 }
  0x1b   : > { %s3554_s21 = scalar_select %p234_p0, %s3405_s29, %s236_s20  }
  0x1c   : > { %p3556_p4 = por %p244_p2, %p243_p1  ;;  %p2748_p6 = scmp.ge.s32.totalorder %s3409_s30, 1 }
  0x1d   : > { %4158 = sst [smem:[#allocation19_spill]] %s3554_s21  ;;  %p515_p7 = scmp.lt.s32.totalorder %s3409_s30, 3 }
  0x1e   : > { %p3565_p8 = por %p4131_p5, %p249_p3  ;;  %s3411_s24 = smov [#allocation4]  }
  0x1f   : > { %p3570_p10 = pnand %p2748_p6, %p515_p7  ;;  %s527_s25 = sshll.u32 %s3411_s24, 4  ;;  %s528_s25 = int_to_ptr.vmem [resolvable:$true] %s527_s25 }
  0x20   : > { %s4160_s2 = scalar_select %p3565_p8, 1, 0 }
  0x21   : > { %s4161_s23 = scalar_select %p3570_p10, 1, 0 }
  0x22   : > { %p3067_p11 = pneg %p3570_p10  ;;  %p3083_p13 = scmp.lt.s32.totalorder %s3409_s30, 2 }
  0x23   : > { %s594_s27 = sand.u32 1, %s3409_s30   ;;  %s596_s1 = sand.u32 1, %s3405_s29  }
  0x24   : > { %p3578_p12 = pnand %p3067_p11, %p4131_p5  ;;  %p3587_p0 = pnand %p3083_p13, %p3556_p4 }
  0x25   : > { %s3242_s24 = scalar_lea.vmem %s528_s25, 256  ;;  %p3250_p7 = scmp.lt.s32.totalorder %s528_s25, %s528_s25 }
  0x26   : > { %p4135_p1 = pneg %p3578_p12  ;;  %p3243_p2 = scmp.ne.s32.totalorder %s528_s25, %s3242_s24 }
  0x27   : > { %p3251_p11 = scmp.lt.s32.totalorder %s3242_s24, %s3242_s24 }
  0x28   : > { %p3245_p3 = pnand %p3243_p2, %p4135_p1 }
  0x29   : > { %p3252_p9 = por %p3251_p11, %p3250_p7 }
  0x2a   : > { %p3246_p6 = pneg %p3245_p3 }
  0x2c   : > { %p3253_p5 = pnand %p3252_p9, %p3246_p6 }
  0x2e   : > { %3256 = shalt.err (!%p3253_p5)
}
  0x2f   : > { %s3412_s21 = smov 128   ;;  %s3413_s22 = smov 8  }
  0x30   : > { %s4164_s18 = sld [smem:[#allocation20_spill]]  ;;  %s3601_s17 = sshll.u32 %s596_s1, 4 }
  0x31   : > { %s2824_s16 = sshll.u32 %s3409_s30, 8  ;;  %s4165_s8 = sld [smem:[#allocation25_spill]] }
  0x32   : > { %s598_s13 = scalar_lea.vmem [#allocation9], %s3601_s17  ;;  %s3614_s10 = scalar_lea.sflag [#allocation5], %s594_s27 }
  0x33   : > { %s605_s11 = sshll.u32 %s598_s13, 4  ;;  %p3259_p5 = pneg %p3587_p0  ;;  %s3612_s11 = int_to_ptr.vmem [resolvable:$true] %s605_s11 }
  0x36   : > { %3070 = dma.hbm_to_vmem [thread:$0]  (!%p3578_p12), %s4164_s18, 256, %s528_s25, [#allocation5], %s3412_s21, %s3412_s21, %s3413_s22  }
  0x37   : > { %s3609_s14 = scalar_lea.hbm %s4165_s8, %s2824_s16  ;;  %s3262_s19 = scalar_lea.hbm %s4165_s8, 512 }
  0x38   : > { %s3257_s18 = scalar_lea.hbm %s3609_s14, 256  ;;  %p3263_p2 = scmp.lt.s32.totalorder %s3609_s14, %s4165_s8 }
  0x39   : > { %p3258_p4 = scmp.ne.s32.totalorder %s3609_s14, %s3257_s18  ;;  %p3264_p3 = scmp.lt.s32.totalorder %s3262_s19, %s3257_s18 }
  0x3b   : > { %p3260_p9 = pnand %p3259_p5, %p3258_p4  ;;  %p3265_p6 = por %p3264_p3, %p3263_p2 }
  0x3d   : > { %p3261_p13 = pneg %p3260_p9 }
  0x3f   : > { %p3266_p7 = pnand %p3265_p6, %p3261_p13 }
  0x41   : > { %3269 = shalt.err (!%p3266_p7)
}
  0x42   : > { %s3270_s13 = scalar_lea.vmem %s3612_s11, 256  ;;  %s3414_s27 = smov [#allocation9]  }
  0x43   : > { %p3271_p11 = scmp.ne.s32.totalorder %s3612_s11, %s3270_s13  ;;  %s3275_s1 = sshll.u32 %s3414_s27, 4  ;;  %s3276_s1 = int_to_ptr.vmem [resolvable:$false] %s3275_s1 }
  0x44   : > { %s3277_s22 = scalar_lea.vmem %s3276_s1, 512  ;;  %p3278_p1 = scmp.lt.s32.totalorder %s3612_s11, %s3276_s1 }
  0x45   : > { %p3273_p4 = pnand %p3271_p11, %p3259_p5  ;;  %p3279_p8 = scmp.lt.s32.totalorder %s3277_s22, %s3270_s13 }
  0x47   : > { %p3274_p9 = pneg %p3273_p4  ;;  %p3280_p10 = por %p3279_p8, %p3278_p1 }
  0x49   : > { %p3281_p2 = pnand %p3280_p10, %p3274_p9 }
  0x4b   : > { %3284 = shalt.err (!%p3281_p2)
}
  0x4c   : > { %s3415_s24 = smov 64   ;;  %s3416_s18 = smov 4  }
  0x4d   : > { %3077 = dma.hbm_to_vmem [thread:$0]  (!%p3587_p0), %s3609_s14, 256, %s3612_s11, %s3614_s10, %s3415_s24, %s3415_s24, %s3416_s18  }
  0x4e   : > { %s3417_s15 = smov [#allocation7]   ;;  %s4166_s12 = sld [smem:[#allocation29_spill]] }
  0x4f   : > { %s541_s29 = sshll.u32 %s3417_s15, 4  ;;  %s637_s13 = scalar_lea.vmem [#allocation10], %s3601_s17  ;;  %s542_s29 = int_to_ptr.vmem [resolvable:$true] %s541_s29 }
  0x50   : > { %s644_s27 = sshll.u32 %s637_s13, 4  ;;  %s3296_s1 = scalar_lea.vmem %s542_s29, 128  ;;  %s645_s27 = int_to_ptr.vmem [resolvable:$true] %s644_s27 }
  0x51   : > { %p3297_p8 = scmp.ne.s32.totalorder %s542_s29, %s3296_s1  ;;  %p4167_p10 = pneg %p3578_p12 }
  0x52   : > { %p3304_p3 = scmp.lt.s32.totalorder %s542_s29, %s542_s29  ;;  %p3305_p6 = scmp.lt.s32.totalorder %s3296_s1, %s3296_s1 }
  0x53   : > { %p3299_p1 = pnand %p3297_p8, %p4167_p10 }
  0x54   : > { %s3649_s25 = scalar_lea.hbm %s4166_s12, %s2824_s16  ;;  %p3306_p7 = por %p3305_p6, %p3304_p3 }
  0x55   : > { %p3300_p13 = pneg %p3299_p1 }
  0x57   : > { %p3307_p11 = pnand %p3306_p7, %p3300_p13 }
  0x59   : > { %3310 = shalt.err (!%p3307_p11)
}
  0x5a   : > { %s4168_s16 = sld [smem:[#allocation21_spill]]  ;;  %s3311_s17 = scalar_lea.hbm %s3649_s25, 256 }
  0x5b   : > { %p3312_p4 = scmp.ne.s32.totalorder %s3649_s25, %s3311_s17  ;;  %s3316_s15 = scalar_lea.hbm %s4166_s12, 512 }
  0x5c   : > { %p3317_p8 = scmp.lt.s32.totalorder %s3649_s25, %s4166_s12  ;;  %p3318_p10 = scmp.lt.s32.totalorder %s3316_s15, %s3311_s17 }
  0x5d   : > { %p3314_p9 = pnand %p3312_p4, %p3259_p5 }
  0x5e   : > { %p3319_p1 = por %p3318_p10, %p3317_p8 }
  0x5f   : > { %p3315_p2 = pneg %p3314_p9 }
  0x60   : > { %3073 = dma.hbm_to_vmem [thread:$0]  (!%p3578_p12), %s4168_s16, 128, %s542_s29, [#allocation8]  }
  0x61   : > { %p3320_p13 = pnand %p3319_p1, %p3315_p2 }
  0x63   : > { %3323 = shalt.err (!%p3320_p13)
}
  0x64   : > { %s3324_s29 = scalar_lea.vmem %s645_s27, 256  ;;  %s3418_s21 = smov [#allocation10]  }
  0x65   : > { %p3325_p12 = scmp.ne.s32.totalorder %s645_s27, %s3324_s29  ;;  %s3329_s13 = sshll.u32 %s3418_s21, 4  ;;  %s3330_s13 = int_to_ptr.vmem [resolvable:$false] %s3329_s13 }
  0x66   : > { %s3331_s1 = scalar_lea.vmem %s3330_s13, 512  ;;  %p3332_p7 = scmp.lt.s32.totalorder %s645_s27, %s3330_s13 }
  0x67   : > { %p3327_p3 = pnand %p3325_p12, %p3259_p5  ;;  %p3333_p11 = scmp.lt.s32.totalorder %s3331_s1, %s3324_s29 }
  0x69   : > { %p3328_p6 = pneg %p3327_p3  ;;  %p3334_p4 = por %p3333_p11, %p3332_p7 }
  0x6b   : > { %p3335_p9 = pnand %p3334_p4, %p3328_p6 }
  0x6d   : > { %3338 = shalt.err (!%p3335_p9)
}
  0x6e   : > { %3080 = dma.hbm_to_vmem [thread:$0]  (!%p3587_p0), %s3649_s25, 256, %s645_s27, %s3614_s10, %s3415_s24, %s3415_s24, %s3416_s18  }
  0x6f   : > { %p4169_p5 = scmp.ne.s32.totalorder %s4161_s23, 0 }
  0x70   : > { %p4170_p2 = scmp.eq.s32.totalorder (!%p4169_p5), %s3541_s0, 0 }
  0x71   : > { %688 = sbr.rel (%p4169_p5) target bundleno = 2990 (0xbae), region = 92 }
  0x76   : > { %3380 = dma.done.wait (%p4170_p2), [#allocation5], 256   ;;  %p4171_p8 = pmov %p4170_p2 }
  0x77   : > { %p4172_p10 = pmov %p4170_p2 }
  0x78   : > { %3382 = vsyncadd (%p4171_p8), [#allocation5], 4294967040 }
  0x79   : > { %3384 = dma.done.wait (%p4172_p10), [#allocation8], 128   ;;  %p4173_p1 = pmov %p4170_p2 }
  0x7a   : > { %s698_s20 = sand.u32 1, %s3541_s0   ;;  %s700_s10 = sand.u32 1, %s3401_s28  }
  0x7b   : > { %3386 = vsyncadd (%p4173_p1), [#allocation8], 4294967168  ;;  %s3694_s24 = sshll.u32 %s700_s10, 4  ;;  %s699_s23 = scalar_lea.sflag [#allocation5], %s698_s20 }
  0x7c   : > { %s3697_s18 = scalar_lea.vmem [#allocation9], %s3694_s24  ;;  %p4174_p0 = scmp.ne.s32.totalorder %s4160_s2, 0 }
  0x7e   : > { %3388 = dma.done.wait (%p4174_p0), %s699_s23, 512  }
  0x7f   : > { %3390 = vsyncadd (%p4174_p0), %s699_s23, 4294966784  ;;  %p814_p13 = scmp.lt.s32.totalorder %s3541_s0, 1  ;;  %s4175_s30 = sld [smem:[#allocation22_spill]] }
  0x80   : > { %s4176_s4 = sld [smem:[#allocation23_spill]]  ;;  %s711_s12 = scalar_lea.vmem [#allocation10], %s3694_s24 }
  0x81   : > { %s3705_s25 = scalar_select %p814_p13, %s3541_s0, 1 }
  0x82   : > { %s4177_s6 = sld [smem:[#allocation24_spill]]  ;;  %p4186_p12 = scmp.ne.s32.totalorder %s3541_s0, 0 }
  0x83   : > { %s2826_s27 = sshll.u32 %s3705_s25, 4  ;;  %s4182_s2 = sld [smem:[#allocation31_spill]] }
  0x84   : > { %s4184_s26 = sld [smem:[#allocation33_spill]] }
  0x85   : > { %s818_s22 = scalar_lea.vmem %s4175_s30, %s2826_s27  ;;  %s4183_s30 = sld [smem:[#allocation32_spill]] }
  0x86   : > { %s3718_s19 = scalar_lea.vmem %s4176_s4, %s2826_s27  ;;  %s4185_s21 = sld [smem:[#allocation34_spill]] }
  0x88   : > { %s3727_s10 = scalar_lea.vmem %s4177_s6, %s2826_s27  ;;  %s4181_s27 = sld [smem:[#allocation30_spill]] }
  0x89   : > { %s2829_s6 = sshll.u32 %s3705_s25, 5 }
  0x8a   : > { %s3753_s11 = scalar_lea.vmem %s4182_s2, %s2829_s6  ;;  %s860_s4 = scalar_lea.vmem %s4184_s26, %s3705_s25 }
  0x8b   : > { %s857_s9 = scalar_lea.vmem %s4183_s30, %s3705_s25  ;;  %868 = sbr.rel (%p4186_p12) target bundleno = 146 (0x92), region = 112 }
  0x8c   : > { %s863_s13 = scalar_lea.vmem %s4185_s21, %s3705_s25 }
  0x8e   : > { %s849_s20 = scalar_lea.vmem %s4181_s27, %s3705_s25 }
  0x90   : > { %v869_v0 = vld [vmem:[#allocation4] sm:$0xff]  ;;  %vm871_vm0 = vcmask 261120   ;;  %v870_v1 = vld [vmem:[#allocation4 + $0x8] sm:$0xff] }
  0x91   : > { %872 = vst.msk [vmem:[#allocation2] sm:$0xff] %vm871_vm0, %v869_v0  ;;  %873 = vst.msk [vmem:[#allocation2 + $0x8] sm:$0xff] %vm871_vm0, %v870_v1 }
  0x92 PF: > { %v3179_v2 = vld [vmem:[%s818_s22 + $0x8] sm:$0xff]   ;;  %v3419_v3 = vmov 0.0   ;;  %v3180_v4 = vld [vmem:[%s818_s22] sm:$0xff]   ;;  %vm3420_vm1 = vmmov 0   ;;  %vm934_vm2 = vcmask 261120   ;;  %s4187_s22 = scalar_lea.vmem %s4115_s3, %s3705_s25  ;;  %s4188_s1 = scalar_lea.vmem %s4117_s5, %s3705_s25  ;;  %vm1169_vm3 = vcmask 64512  }
  0x93   : > { %2887 = vmatprep.subr.bf16.mxu1 %v3419_v3  ;;  %2903 = vmatprep.subr.bf16.mxu0 %v3419_v3  ;;  %v3181_v7 = vld [vmem:[%s3718_s19 + $0x8] sm:$0xff]   ;;  %v3182_v9 = vld [vmem:[%s3718_s19] sm:$0xff]   ;;  %s3421_s19 = smov 120   ;;  %s3422_s27 = smov 104   ;;  %vm1413_vm4 = vcmask 1043456   ;;  %vm2414_vm5 = vcmask 523264  }
  0x94   : > { %2888 = vmatpush3.bf16.msra.mxu1 %v3179_v2  ;;  %2891 = vmatprep.mubr.msk.bf16.mxu1 %vm3420_vm1, %v3419_v3  ;;  %v3183_v10 = vld [vmem:[%s3727_s10 + $0x8] sm:$0xff]   ;;  %v3184_v11 = vld [vmem:[%s3727_s10] sm:$0xff]   ;;  %s3423_s23 = smov 112   ;;  %s4189_s17 = scalar_lea.vmem %s4119_s7, %s3705_s25 }
  0x95   : > { %2889 = vmatprep.subr.bf16.mxu1 %v3419_v3  ;;  %2907 = vmatprep.mubr.msk.bf16.mxu0 %vm3420_vm1, %v3419_v3  ;;  %v2772_v13 = vld [vmem:[%s4187_s22] ss:$0 sm:$0xff]  ;;  %s4190_s14 = sld [smem:[#allocation26_spill]]  ;;  %p2819_p3 = scmp.ne.s32.totalorder %s3541_s0, 1 }
  0x96   : > { %2904 = vmatpush3.bf16.msra.mxu0 %v3183_v10  ;;  %v2776_v21 = vld [vmem:[%s4188_s1] ss:$0 sm:$0xff]  ;;  %s4192_s29 = sld [smem:[#allocation27_spill]] }
  0x97   : > { %2905 = vmatprep.subr.bf16.mxu0 %v3419_v3  ;;  %v2780_v58 = vld [vmem:[%s4189_s17] ss:$0 sm:$0xff]  ;;  %s4194_s28 = sld [smem:[#allocation28_spill]] }
  0x98   : > { %v3774_v5 = vld [vmem:[#allocation2] sm:$0xff]  ;;  %v3776_v6 = vld [vmem:[#allocation2 + $0x8] sm:$0xff]  ;;  %2890 = vmatpush3.bf16.msra.mxu1 %v3180_v4 }
  0x99   : > { %v876_v8 = vpack.c.bf16 %v3776_v6, %v3774_v5  ;;  %2895 = vmatprep.subr.bf16.mxu1 %v3419_v3 }
  0x9a   : > { %2906 = vmatpush3.bf16.msra.mxu0 %v3184_v11 }
  0x9b   : > { %2892 = vmatmul.mubr.msk.bf16.vlgmr.msra.gmra.mxu1 %vm934_vm2, %v876_v8  ;;  %2917 = vmatprep.subr.bf16.mxu0 %v3419_v3  ;;  %s4191_s26 = scalar_lea.vmem %s4190_s14, %s3705_s25 }
  0x9c   : > { %2896 = vmatpush3.bf16.msra.mxu1 %v3181_v7  ;;  %2899 = vmatprep.mubr.msk.bf16.mxu1 %vm3420_vm1, %v3419_v3  ;;  %s4193_s21 = scalar_lea.vmem %s4192_s29, %s3705_s25 }
  0x9d   : > { %2897 = vmatprep.subr.bf16.mxu1 %v3419_v3  ;;  %2908 = vmatmul.mubr.msk.bf16.vlgmr.msra.gmra.mxu0 %vm934_vm2, %v876_v8  ;;  %s4195_s22 = scalar_lea.vmem %s4194_s28, %s3705_s25 }
  0x9e   : > { %2919 = vmatprep.mubr.msk.bf16.mxu0 %vm3420_vm1, %v3419_v3 }
  0xa0   : > { %2898 = vmatpush3.bf16.msra.mxu1 %v3182_v9 }
  0xa1   : > { %2911 = vmatprep.subr.bf16.mxu1 %v3419_v3 }
  0xa3   : > { %2900 = vmatmul.mubr.msk.bf16.vlgmr.msra.gmra.mxu1 %vm934_vm2, %v876_v8  ;;  %v3873_v8 = vld [vmem:[#allocation7] sm:$0xff] }
  0xa4   : > { %2913 = vmatprep.mubr.msk.bf16.mxu1 %vm3420_vm1, %v3419_v3 }
 0x15b   : > { %v972_v12 = vpop.f32.mrf.mxu1 }
 0x15c   : > { %v973_v16 = vadd.f32 %v2772_v13, %v972_v12 }
 0x15d   : > { %v2893_v14 = vpop.f32.mrf.mxu1  ;;  %v1090_v59 = vpop.f32.mrf.mxu0 }
 0x15e   : > { %v1091_v61 = vadd.f32 %v2780_v58, %v1090_v59 }
 0x15f   : > { %v975_v15 = vpop.f32.mrf.mxu1  ;;  %v2909_v60 = vpop.f32.mrf.mxu0 }
 0x160   : > { %v976_v17 = vadd.f32 %v2772_v13, %v975_v15 }
 0x161   : > { %v2894_v18 = vpop.f32.mrf.mxu1  ;;  %v1093_v62 = vpop.f32.mrf.mxu0 }
 0x162   : > { %v3144_v19 = vpack.i.bf16 %v976_v17, %v973_v16  ;;  %v3821_v30 = vpack.c.bf16 %v976_v17, %v973_v16  ;;  %v1094_v63 = vadd.f32 %v2780_v58, %v1093_v62 }
 0x163   : > { %v1031_v20 = vpop.f32.mrf.mxu1  ;;  %v2910_v0 = vpop.f32.mrf.mxu0 }
 0x164   : > { %3145 = vrot.lane.b32.xlu1 %v3144_v19, %s3421_s19  ;;  %v1032_v24 = vadd.f32 %v2776_v21, %v1031_v20  ;;  %v3866_v1 = vpack.c.bf16 %v1094_v63, %v1091_v61  ;;  %v3870_v4 = vpack.i.bf16 %v1094_v63, %v1091_v61 }
 0x165   : > { %v2901_v22 = vpop.f32.mrf.mxu1 }
 0x166   : > { %v1415_v2 = vsel %vm1413_vm4, %v3866_v1, 0 }
 0x167   : > { %v1034_v23 = vpop.f32.mrf.mxu1 }
 0x168   : > { %v1035_v25 = vadd.f32 %v2776_v21, %v1034_v23 }
 0x169   : > { %v2902_v26 = vpop.f32.mrf.mxu1 }
 0x16a   : > { %v3149_v27 = vpack.i.bf16 %v1035_v25, %v1032_v24  ;;  %v3812_v28 = vpack.c.bf16 %v1035_v25, %v1032_v24 }
 0x16c   : > { %3150 = vrot.lane.b32.xlu1 %v3149_v27, %s3422_s27  ;;  %3135 = vrot.lane.b32.xlu0 %v3149_v27, %s3421_s19  ;;  %v1174_v29 = vsel %vm1169_vm3, %v3812_v28, 0 }
 0x16d   : > { %2912 = vmatpush3.bf16.xpose.msra.mxu1 %v1174_v29 }
 0x16e   : > { %2923 = vmatprep.subr.bf16.mxu1 %v3419_v3 }
 0x170   : > { %3160 = vrot.lane.b32.xlu1 %v3144_v19, %s3422_s27  ;;  %3140 = vrot.lane.b32.xlu0 %v3149_v27, %s3423_s23 }
 0x174   : > { %3155 = vrot.lane.b32.xlu0 %v3144_v19, %s3423_s23  ;;  %2914 = vmatmul.mubr.msk.bf16.vlgmr.msra.gmra.mxu1 %vm1169_vm3, %v3821_v30 }
 0x175   : > { %2925 = vmatprep.mubr.msk.bf16.mxu1 %vm3420_vm1, %v3419_v3 }
 0x1d6   : > { %v3146_v31 = vpop.permute.xlu1 %3145 }
 0x1d7   : > { %v3148_v44 = vunpack.i.h.bf16 %v3146_v31  ;;  %v3147_v45 = vunpack.i.l.bf16 %v3146_v31 }
 0x1d9   : > { %v3840_v51 = vpack.c.bf16 %v3148_v44, %v3147_v45 }
 0x1de   : > { %v3136_v32 = vpop.permute.xlu0 %3135  ;;  %v3151_v35 = vpop.permute.xlu1 %3150 }
 0x1df   : > { %v3138_v33 = vunpack.i.h.bf16 %v3136_v32  ;;  %v3137_v34 = vunpack.i.l.bf16 %v3136_v32  ;;  %v3153_v40 = vunpack.i.h.bf16 %v3151_v35  ;;  %v3152_v41 = vunpack.i.l.bf16 %v3151_v35 }
 0x1e1   : > { %v3828_v36 = vpack.c.bf16 %v3138_v33, %v3137_v34  ;;  %v3837_v48 = vpack.c.bf16 %v3153_v40, %v3152_v41 }
 0x1e2   : > { %v3141_v37 = vpop.permute.xlu0 %3140  ;;  %v3161_v52 = vpop.permute.xlu1 %3160 }
 0x1e3   : > { %v3143_v38 = vunpack.i.h.bf16 %v3141_v37  ;;  %v3142_v39 = vunpack.i.l.bf16 %v3141_v37  ;;  %v1220_v42 = vsel %vm1169_vm3, %v3828_v36, 0  ;;  %v1312_v53 = vsel %vm1169_vm3, %v3837_v48, 0 }
 0x1e4   : > { %2918 = vmatpush3.bf16.xpose.msra.mxu0 %v1220_v42  ;;  %v3163_v55 = vunpack.i.h.bf16 %v3161_v52  ;;  %v3162_v56 = vunpack.i.l.bf16 %v3161_v52 }
 0x1e5   : > { %v3832_v43 = vpack.c.bf16 %v3143_v38, %v3142_v39  ;;  %2929 = vmatprep.subr.bf16.mxu0 %v3419_v3 }
 0x1e6   : > { %v3156_v46 = vpop.permute.xlu0 %3155  ;;  %v3855_v57 = vpack.c.bf16 %v3163_v55, %v3162_v56 }
 0x1e7   : > { %v1266_v47 = vsel %vm1169_vm3, %v3832_v43, 0  ;;  %v3158_v49 = vunpack.i.h.bf16 %v3156_v46  ;;  %v3157_v50 = vunpack.i.l.bf16 %v3156_v46 }
 0x1e8   : > { %2924 = vmatpush3.bf16.xpose.msra.mxu1 %v1266_v47 }
 0x1e9   : > { %2935 = vmatprep.subr.bf16.mxu1 %v3419_v3  ;;  %v3846_v54 = vpack.c.bf16 %v3158_v49, %v3157_v50 }
 0x1eb   : > { %2920 = vmatmul.mubr.msk.bf16.vlgmr.msra.gmra.mxu0 %vm1169_vm3, %v3840_v51 }
 0x1ec   : > { %2930 = vmatpush3.bf16.xpose.msra.mxu0 %v1312_v53  ;;  %2931 = vmatprep.mubr.msk.bf16.mxu0 %vm3420_vm1, %v3419_v3 }
 0x1ed   : > { %2941 = vmatprep.subr.bf16.mxu0 %v3419_v3 }
 0x1ef   : > { %2926 = vmatmul.mubr.msk.bf16.vlgmr.msra.gmra.mxu1 %vm1169_vm3, %v3846_v54 }
 0x1f0   : > { %2937 = vmatprep.mubr.msk.bf16.mxu1 %vm3420_vm1, %v3419_v3  ;;  %2936 = vmatpush3.bf16.msra.mxu1 %v1415_v2 }
 0x1f1   : > { %2947 = vmatprep.subr.bf16.mxu1 %v3419_v3 }
 0x1f3   : > { %2932 = vmatmul.mubr.msk.bf16.vlgmr.msra.gmra.mxu0 %vm1169_vm3, %v3855_v57 }
 0x1f4   : > { %2943 = vmatprep.mubr.msk.bf16.mxu0 %vm3420_vm1, %v3419_v3 }
 0x234   : > { %v1210_v7 = vpop.f32.mrf.mxu1 }
 0x235   : > { %v1354_v9 = vmul.f32 0.35355338, %v1210_v7 }
 0x236   : > { %v2915_v10 = vpop.f32.mrf.mxu1 }
 0x237   : > { %v1358_v11 = vadd.f32 %v1354_v9, %v3873_v8 }
 0x238   : > { %v1213_v12 = vpop.f32.mrf.mxu1 }
 0x239   : > { %v1362_v13 = vsel %vm1169_vm3, %v1358_v11, -inf }
 0x23a   : > { %1363 = vmax.xlane.f32.xlu0 %v1362_v13  ;;  %v2916_v14 = vpop.f32.mrf.mxu1 }
 0x2ab   : > { %v1256_v15 = vpop.f32.mrf.mxu0 }
 0x2ac   : > { %v1355_v16 = vmul.f32 0.35355338, %v1256_v15 }
 0x2ad   : > { %v2921_v17 = vpop.f32.mrf.mxu0 }
 0x2ae   : > { %v1359_v19 = vadd.f32 %v1355_v16, %v3873_v8 }
 0x2af   : > { %v1302_v18 = vpop.f32.mrf.mxu1  ;;  %v1259_v20 = vpop.f32.mrf.mxu0 }
 0x2b0   : > { %v1356_v21 = vmul.f32 0.35355338, %v1302_v18  ;;  %v1365_v22 = vsel %vm1169_vm3, %v1359_v19, -inf }
 0x2b1   : > { %v2927_v23 = vpop.f32.mrf.mxu1  ;;  %1366 = vmax.xlane.f32.xlu1 %v1365_v22  ;;  %v2922_v24 = vpop.f32.mrf.mxu0 }
 0x2b2   : > { %v1360_v25 = vadd.f32 %v1356_v21, %v3873_v8 }
 0x2b3   : > { %v1305_v26 = vpop.f32.mrf.mxu1  ;;  %v1348_v27 = vpop.f32.mrf.mxu0 }
 0x2b4   : > { %v1368_v29 = vsel %vm1169_vm3, %v1360_v25, -inf  ;;  %v1357_v31 = vmul.f32 0.35355338, %v1348_v27 }
 0x2b5   : > { %1369 = vmax.xlane.f32.xlu0 %v1368_v29  ;;  %v2928_v32 = vpop.f32.mrf.mxu1  ;;  %v2933_v33 = vpop.f32.mrf.mxu0 }
 0x2b6   : > { %v1361_v34 = vadd.f32 %v1357_v31, %v3873_v8  ;;  %v1602_v33 = vrot.slane %v3812_v28, 4 }
 0x2b7   : > { %v1351_v35 = vpop.f32.mrf.mxu0 }
 0x2b8   : > { %v1371_v37 = vsel %vm1169_vm3, %v1361_v34, -inf }
 0x2b9   : > { %v2934_v38 = vpop.f32.mrf.mxu0  ;;  %1372 = vmax.xlane.f32.xlu0 %v1371_v37 }
 0x2ba   : > { %v1607_v38 = vsel %vm1169_vm3, %v1602_v33, 0 }
 0x2c2   : > { %3165 = vrot.lane.b32.xlu1 %v3870_v4, %s3421_s19 }
 0x2c3   : > { %v1364_v39 = vpop.xlane.xlu0 %1363 }
 0x2c4   : > { %v1374_v40 = vsub.f32 %v1358_v11, %v1364_v39  ;;  %v1652_v39 = vrot.slane %v3828_v36, 4 }
 0x2c6   : > { %v1378_v41 = vmul.f32 1.442695, %v1374_v40 }
 0x2c8   : > { %3191 = vpow2.f32 %v1378_v41  ;;  %v1702_v41 = vrot.slane %v3832_v43, 4  ;;  %v1856_v43 = vrot.slane %v3866_v1, 4 }
 0x2ca   : > { %v1707_v36 = vsel %vm1169_vm3, %v1702_v41, 0 }
 0x2d5   : > { %v3192_v42 = vpop.eup %3191 }
 0x2d6   : > { %v1386_v44 = vsel %vm1169_vm3, %v3192_v42, 0.0 }
 0x2e6   : > { %1387 = vadd.xlane.f32.xlu1 %v1386_v44  ;;  %v1600_v44 = vrot.slane %v3821_v30, 4  ;;  %v1650_v30 = vrot.slane %v3840_v51, 4 }
 0x33a   : > { %v1367_v45 = vpop.xlane.xlu1 %1366 }
 0x33b   : > { %v1375_v46 = vsub.f32 %v1359_v19, %v1367_v45  ;;  %v1752_v45 = vrot.slane %v3837_v48, 4  ;;  %v1861_v48 = vsel %vm1413_vm4, %v1856_v43, 0 }
 0x33d   : > { %v1380_v47 = vmul.f32 1.442695, %v1375_v46  ;;  %v1757_v46 = vsel %vm1169_vm3, %v1752_v45, 0 }
 0x33e   : > { %v1370_v49 = vpop.xlane.xlu0 %1369  ;;  %v3166_v50 = vpop.permute.xlu1 %3165 }
 0x33f   : > { %v1376_v52 = vsub.f32 %v1360_v25, %v1370_v49  ;;  %3193 = vpow2.f32 %v1380_v47  ;;  %v3168_v53 = vunpack.i.h.bf16 %v3166_v50  ;;  %v3167_v55 = vunpack.i.l.bf16 %v3166_v50 }
 0x340   : > { %v1700_v47 = vrot.slane %v3846_v54, 4  ;;  %v1750_v54 = vrot.slane %v3855_v57, 4 }
 0x341   : > { %v1382_v56 = vmul.f32 1.442695, %v1376_v52  ;;  %v3886_v58 = vpack.c.bf16 %v3168_v53, %v3167_v55 }
 0x342   : > { %v1373_v59 = vpop.xlane.xlu0 %1372 }
 0x343   : > { %3195 = vpow2.f32 %v1382_v56  ;;  %v1377_v60 = vsub.f32 %v1361_v34, %v1373_v59  ;;  %v1461_v61 = vsel %vm1413_vm4, %v3886_v58, 0  ;;  %v1904_v51 = vrot.slane %v3886_v58, 4 }
 0x344   : > { %2942 = vmatpush3.bf16.msra.mxu0 %v1461_v61 }
 0x345   : > { %v1384_v62 = vmul.f32 1.442695, %v1377_v60  ;;  %2953 = vmatprep.subr.bf16.mxu0 %v3419_v3  ;;  %v1909_v1 = vsel %vm1413_vm4, %v1904_v51, 0 }
 0x347   : > { %3197 = vpow2.f32 %v1384_v62 }
 0x34c   : > { %v3194_v63 = vpop.eup %3193 }
 0x34d   : > { %v1389_v0 = vsel %vm1169_vm3, %v3194_v63, 0.0 }
 0x34e   : > { %1390 = vadd.xlane.f32.xlu0 %v1389_v0 }
 0x350   : > { %v3196_v2 = vpop.eup %3195 }
 0x351   : > { %v1392_v7 = vsel %vm1169_vm3, %v3196_v2, 0.0 }
 0x352   : > { %1393 = vadd.xlane.f32.xlu1 %v1392_v7 }
 0x354   : > { %v3198_v9 = vpop.eup %3197 }
 0x355   : > { %v1395_v10 = vsel %vm1169_vm3, %v3198_v9, 0.0 }
 0x356   : > { %1396 = vadd.xlane.f32.xlu0 %v1395_v10 }
 0x363   : > { %3175 = vrot.lane.b32.xlu1 %v3870_v4, %s3422_s27 }
 0x36c   : > { %3170 = vrot.lane.b32.xlu0 %v3870_v4, %s3423_s23 }
 0x36f   : > { %v1388_v11 = vpop.xlane.xlu1 %1387 }
 0x370   : > { %3199 = vrcp.f32 %v1388_v11 }
 0x37d   : > { %v3200_v12 = vpop.eup %3199 }
 0x37e   : > { %v1402_v13 = vmul.f32 %v3200_v12, %v3192_v42  ;;  %v1657_v42 = vsel %vm1169_vm3, %v1652_v39, 0 }
 0x380   : > { %v1406_v14 = vpack.c.bf16 %v1402_v13, %v1402_v13 }
 0x382   : > { %2938 = vmatmul.mubr.msk.bf16.vlgmr.msra.gmra.mxu1 %vm1169_vm3, %v1406_v14 }
 0x383   : > { %2949 = vmatprep.mubr.msk.bf16.mxu1 %vm3420_vm1, %v3419_v3 }
 0x3d7   : > { %v1391_v15 = vpop.xlane.xlu0 %1390 }
 0x3d8   : > { %3201 = vrcp.f32 %v1391_v15 }
 0x3db   : > { %v1394_v16 = vpop.xlane.xlu1 %1393 }
 0x3dc   : > { %3203 = vrcp.f32 %v1394_v16 }
 0x3df   : > { %v3176_v17 = vpop.permute.xlu1 %3175  ;;  %v1397_v18 = vpop.xlane.xlu0 %1396 }
 0x3e0   : > { %3205 = vrcp.f32 %v1397_v18  ;;  %v3178_v19 = vunpack.i.h.bf16 %v3176_v17  ;;  %v3177_v20 = vunpack.i.l.bf16 %v3176_v17 }
 0x3e2   : > { %v3901_v24 = vpack.c.bf16 %v3178_v19, %v3177_v20 }
 0x3e3   : > { %v3171_v4 = vpop.permute.xlu0 %3170 }
 0x3e4   : > { %v3173_v21 = vunpack.i.h.bf16 %v3171_v4  ;;  %v3172_v22 = vunpack.i.l.bf16 %v3171_v4  ;;  %v1553_v34 = vsel %vm1413_vm4, %v3901_v24, 0 }
 0x3e5   : > { %v3202_v23 = vpop.eup %3201 }
 0x3e6   : > { %v3903_v25 = vpack.c.bf16 %v3173_v21, %v3172_v22  ;;  %v1403_v26 = vmul.f32 %v3202_v23, %v3194_v63 }
 0x3e8   : > { %v1507_v29 = vsel %vm1413_vm4, %v3903_v25, 0  ;;  %v1407_v31 = vpack.c.bf16 %v1403_v26, %v1403_v26 }
 0x3e9   : > { %v3204_v27 = vpop.eup %3203  ;;  %2948 = vmatpush3.bf16.msra.mxu1 %v1507_v29 }
 0x3ea   : > { %v1404_v32 = vmul.f32 %v3204_v27, %v3196_v2  ;;  %2944 = vmatmul.mubr.msk.bf16.vlgmr.msra.gmra.mxu0 %vm1169_vm3, %v1407_v31  ;;  %2959 = vmatprep.subr.bf16.mxu1 %v3419_v3 }
 0x3eb   : > { %2954 = vmatpush3.bf16.msra.mxu0 %v1553_v34  ;;  %2955 = vmatprep.mubr.msk.bf16.mxu0 %vm3420_vm1, %v3419_v3 }
 0x3ec   : > { %v1408_v35 = vpack.c.bf16 %v1404_v32, %v1404_v32  ;;  %2965 = vmatprep.subr.bf16.mxu0 %v3419_v3 }
 0x3ed   : > { %v3206_v37 = vpop.eup %3205 }
 0x3ee   : > { %2950 = vmatmul.mubr.msk.bf16.vlgmr.msra.gmra.mxu1 %vm1169_vm3, %v1408_v35  ;;  %v1405_v28 = vmul.f32 %v3206_v37, %v3198_v9 }
 0x3ef   : > { %2960 = vmatpush3.bf16.xpose.msra.mxu1 %v1607_v38  ;;  %2961 = vmatprep.mubr.msk.bf16.mxu1 %vm3420_vm1, %v3419_v3 }
 0x3f0   : > { %2971 = vmatprep.subr.bf16.mxu1 %v3419_v3  ;;  %v1409_v40 = vpack.c.bf16 %v1405_v28, %v1405_v28 }
 0x3f2   : > { %2956 = vmatmul.mubr.msk.bf16.vlgmr.msra.gmra.mxu0 %vm1169_vm3, %v1409_v40 }
 0x3f3   : > { %2966 = vmatpush3.bf16.xpose.msra.mxu0 %v1657_v42  ;;  %2967 = vmatprep.mubr.msk.bf16.mxu0 %vm3420_vm1, %v3419_v3 }
 0x3f4   : > { %2977 = vmatprep.subr.bf16.mxu0 %v3419_v3 }
 0x3f6   : > { %2962 = vmatmul.mubr.msk.bf16.vlgmr.msra.gmra.mxu1 %vm1169_vm3, %v1600_v44 }
 0x3f7   : > { %2972 = vmatpush3.bf16.xpose.msra.mxu1 %v1707_v36  ;;  %2973 = vmatprep.mubr.msk.bf16.mxu1 %vm3420_vm1, %v3419_v3 }
 0x3f8   : > { %2983 = vmatprep.subr.bf16.mxu1 %v3419_v3 }
 0x3fa   : > { %2968 = vmatmul.mubr.msk.bf16.vlgmr.msra.gmra.mxu0 %vm1169_vm3, %v1650_v30 }
 0x3fb   : > { %2978 = vmatpush3.bf16.xpose.msra.mxu0 %v1757_v46  ;;  %2979 = vmatprep.mubr.msk.bf16.mxu0 %vm3420_vm1, %v3419_v3 }
 0x3fc   : > { %2989 = vmatprep.subr.bf16.mxu0 %v3419_v3 }
 0x3fe   : > { %2974 = vmatmul.mubr.msk.bf16.vlgmr.msra.gmra.mxu1 %vm1169_vm3, %v1700_v47 }
 0x3ff   : > { %2984 = vmatpush3.bf16.msra.mxu1 %v1861_v48  ;;  %2985 = vmatprep.mubr.msk.bf16.mxu1 %vm3420_vm1, %v3419_v3 }
 0x400   : > { %2995 = vmatprep.subr.bf16.mxu1 %v3419_v3 }
 0x402   : > { %2980 = vmatmul.mubr.msk.bf16.vlgmr.msra.gmra.mxu0 %vm1169_vm3, %v1750_v54 }
 0x403   : > { %2990 = vmatpush3.bf16.msra.mxu0 %v1909_v1  ;;  %2991 = vmatprep.mubr.msk.bf16.mxu0 %vm3420_vm1, %v3419_v3 }
 0x404   : > { %3001 = vmatprep.subr.bf16.mxu0 %v3419_v3 }
 0x442   : > { %v1451_v49 = vpop.f32.mrf.mxu1 }
 0x443   : > { %1595 = vst.msk [vmem:[#allocation3] sm:$0xff] %vm1169_vm3, %v1451_v49 }
 0x444   : > { %v2939_v50 = vpop.f32.mrf.mxu1 }
 0x446   : > { %v1454_v52 = vpop.f32.mrf.mxu1 }
 0x448   : > { %v2940_v53 = vpop.f32.mrf.mxu1 }
 0x4aa   : > { %v1497_v55 = vpop.f32.mrf.mxu0 }
 0x4ab   : > { %1596 = vst.msk [vmem:[#allocation3 + $0x10] sm:$0xff] %vm1169_vm3, %v1497_v55 }
 0x4ac   : > { %v2945_v57 = vpop.f32.mrf.mxu0 }
 0x4ae   : > { %v1543_v56 = vpop.f32.mrf.mxu1  ;;  %v1500_v58 = vpop.f32.mrf.mxu0 }
 0x4af   : > { %1597 = vst.msk [vmem:[#allocation3 + $0x20] sm:$0xff] %vm1169_vm3, %v1543_v56 }
 0x4b0   : > { %v2951_v59 = vpop.f32.mrf.mxu1  ;;  %v2946_v60 = vpop.f32.mrf.mxu0 }
 0x4b2   : > { %v1546_v61 = vpop.f32.mrf.mxu1  ;;  %v1589_v62 = vpop.f32.mrf.mxu0 }
 0x4b3   : > { %1598 = vst.msk [vmem:[#allocation3 + $0x30] sm:$0xff] %vm1169_vm3, %v1589_v62  ;;  %v1952_v62 = vrot.slane %v3903_v25, 4 }
 0x4b4   : > { %v2952_v63 = vpop.f32.mrf.mxu1  ;;  %v2957_v0 = vpop.f32.mrf.mxu0 }
 0x4b6   : > { %v1643_v2 = vpop.f32.mrf.mxu1  ;;  %v1592_v7 = vpop.f32.mrf.mxu0 }
 0x4b7   : > { %v1799_v9 = vmul.f32 0.35355338, %v1643_v2  ;;  %v1957_v2 = vsel %vm1413_vm4, %v1952_v62, 0 }
 0x4b8   : > { %v2963_v10 = vpop.f32.mrf.mxu1  ;;  %v2958_v11 = vpop.f32.mrf.mxu0 }
 0x4b9   : > { %v1803_v12 = vadd.f32 %v1799_v9, %v3873_v8  ;;  %v2000_v9 = vrot.slane %v3901_v24, 4 }
 0x4ba   : > { %v1646_v13 = vpop.f32.mrf.mxu1  ;;  %v1693_v14 = vpop.f32.mrf.mxu0 }
 0x4bb   : > { %v1807_v15 = vsel %vm1169_vm3, %v1803_v12, -inf  ;;  %v1800_v16 = vmul.f32 0.35355338, %v1693_v14  ;;  %v2005_v25 = vsel %vm1413_vm4, %v2000_v9, 0 }
 0x4bc   : > { %1808 = vmax.xlane.f32.xlu1 %v1807_v15  ;;  %v2964_v17 = vpop.f32.mrf.mxu1  ;;  %v2969_v18 = vpop.f32.mrf.mxu0 }
 0x4bd   : > { %v1804_v20 = vadd.f32 %v1800_v16, %v3873_v8  ;;  %v890_v16 = vld [vmem:[%s3697_s18] sm:$0xf]  ;;  %v891_v18 = vld [vmem:[%s3697_s18 + $0x4] sm:$0xf] }
 0x4be   : > { %v1743_v19 = vpop.f32.mrf.mxu1  ;;  %v1696_v4 = vpop.f32.mrf.mxu0  ;;  %v2067_v17 = vsel %vm1413_vm4, %v890_v16, 0 }
 0x4bf   : > { %v1801_v21 = vmul.f32 0.35355338, %v1743_v19  ;;  %v1810_v22 = vsel %vm1169_vm3, %v1804_v20, -inf  ;;  %v2114_v19 = vsel %vm1413_vm4, %v891_v18, 0 }
 0x4c0   : > { %v2975_v23 = vpop.f32.mrf.mxu1  ;;  %1811 = vmax.xlane.f32.xlu0 %v1810_v22  ;;  %v2970_v26 = vpop.f32.mrf.mxu0 }
 0x4c1   : > { %v1805_v27 = vadd.f32 %v1801_v21, %v3873_v8  ;;  %v892_v26 = vld [vmem:[%s3697_s18 + $0x8] sm:$0xf] }
 0x4c2   : > { %v1746_v29 = vpop.f32.mrf.mxu1  ;;  %v1793_v31 = vpop.f32.mrf.mxu0 }
 0x4c3   : > { %v1813_v32 = vsel %vm1169_vm3, %v1805_v27, -inf  ;;  %v1802_v33 = vmul.f32 0.35355338, %v1793_v31  ;;  %v2051_v29 = vld [vmem:[#allocation3] sm:$0xff] }
 0x4c4   : > { %v2976_v34 = vpop.f32.mrf.mxu1  ;;  %v2981_v35 = vpop.f32.mrf.mxu0  ;;  %1814 = vmax.xlane.f32.xlu0 %v1813_v32 }
 0x4c5   : > { %v1806_v37 = vadd.f32 %v1802_v33, %v3873_v8  ;;  %v2161_v35 = vsel %vm1413_vm4, %v892_v26, 0 }
 0x4c6   : > { %v1796_v38 = vpop.f32.mrf.mxu0 }
 0x4c7   : > { %v1816_v28 = vsel %vm1169_vm3, %v1806_v37, -inf }
 0x4c8   : > { %v2982_v39 = vpop.f32.mrf.mxu0  ;;  %1817 = vmax.xlane.f32.xlu1 %v1816_v28  ;;  %v893_v28 = vld [vmem:[%s3697_s18 + $0xc] sm:$0xf] }
 0x545   : > { %v1809_v40 = vpop.xlane.xlu1 %1808 }
 0x546   : > { %v1819_v41 = vsub.f32 %v1803_v12, %v1809_v40 }
 0x548   : > { %v1823_v42 = vmul.f32 1.442695, %v1819_v41  ;;  %v2053_v41 = vld [vmem:[#allocation3 + $0x10] sm:$0xff] }
 0x549   : > { %v1812_v44 = vpop.xlane.xlu0 %1811 }
 0x54a   : > { %3207 = vpow2.f32 %v1823_v42  ;;  %v1820_v36 = vsub.f32 %v1804_v20, %v1812_v44 }
 0x54c   : > { %v1825_v45 = vmul.f32 1.442695, %v1820_v36  ;;  %v2208_v36 = vsel %vm1413_vm4, %v893_v28, 0 }
 0x54d   : > { %v1815_v30 = vpop.xlane.xlu0 %1814 }
 0x54e   : > { %3209 = vpow2.f32 %v1825_v45  ;;  %v1821_v43 = vsub.f32 %v1805_v27, %v1815_v30 }
 0x550   : > { %v1827_v46 = vmul.f32 1.442695, %v1821_v43 }
 0x551   : > { %v1818_v47 = vpop.xlane.xlu1 %1817 }
 0x552   : > { %3211 = vpow2.f32 %v1827_v46  ;;  %v1822_v48 = vsub.f32 %v1806_v37, %v1818_v47  ;;  %v2055_v46 = vld [vmem:[#allocation3 + $0x20] sm:$0xff] }
 0x554   : > { %v1829_v8 = vmul.f32 1.442695, %v1822_v48 }
 0x556   : > { %3213 = vpow2.f32 %v1829_v8 }
 0x557   : > { %v3208_v51 = vpop.eup %3207 }
 0x558   : > { %v1831_v54 = vsel %vm1169_vm3, %v3208_v51, 0.0 }
 0x559   : > { %1832 = vadd.xlane.f32.xlu0 %v1831_v54 }
 0x55b   : > { %v3210_v1 = vpop.eup %3209 }
 0x55c   : > { %v1834_v49 = vsel %vm1169_vm3, %v3210_v1, 0.0 }
 0x55d   : > { %1835 = vadd.xlane.f32.xlu1 %v1834_v49 }
 0x55f   : > { %v3212_v50 = vpop.eup %3211 }
 0x560   : > { %v1837_v52 = vsel %vm1169_vm3, %v3212_v50, 0.0 }
 0x561   : > { %1838 = vadd.xlane.f32.xlu0 %v1837_v52 }
 0x563   : > { %v3214_v53 = vpop.eup %3213 }
 0x564   : > { %v1840_v55 = vsel %vm1169_vm3, %v3214_v53, 0.0 }
 0x565   : > { %1841 = vadd.xlane.f32.xlu1 %v1840_v55 }
 0x5e2   : > { %v1833_v57 = vpop.xlane.xlu0 %1832 }
 0x5e3   : > { %3215 = vrcp.f32 %v1833_v57 }
 0x5e6   : > { %v1836_v56 = vpop.xlane.xlu1 %1835 }
 0x5e7   : > { %3217 = vrcp.f32 %v1836_v56 }
 0x5ea   : > { %v1839_v58 = vpop.xlane.xlu0 %1838 }
 0x5eb   : > { %3219 = vrcp.f32 %v1839_v58 }
 0x5ee   : > { %v1842_v59 = vpop.xlane.xlu1 %1841 }
 0x5ef   : > { %3221 = vrcp.f32 %v1842_v59 }
 0x5f0   : > { %v3216_v60 = vpop.eup %3215 }
 0x5f1   : > { %v1847_v61 = vmul.f32 %v3216_v60, %v3208_v51  ;;  %v2057_v51 = vld [vmem:[#allocation3 + $0x30] sm:$0xff] }
 0x5f3   : > { %v1851_v63 = vpack.c.bf16 %v1847_v61, %v1847_v61 }
 0x5f4   : > { %v3218_v0 = vpop.eup %3217 }
 0x5f5   : > { %2986 = vmatmul.mubr.msk.bf16.vlgmr.msra.gmra.mxu1 %vm1169_vm3, %v1851_v63  ;;  %v1848_v7 = vmul.f32 %v3218_v0, %v3210_v1 }
 0x5f6   : > { %2996 = vmatpush3.bf16.msra.mxu1 %v1957_v2  ;;  %2997 = vmatprep.mubr.msk.bf16.mxu1 %vm3420_vm1, %v3419_v3 }
 0x5f7   : > { %3007 = vmatprep.subr.bf16.mxu1 %v3419_v3  ;;  %v1852_v10 = vpack.c.bf16 %v1848_v7, %v1848_v7 }
 0x5f8   : > { %v3220_v11 = vpop.eup %3219 }
 0x5f9   : > { %2992 = vmatmul.mubr.msk.bf16.vlgmr.msra.gmra.mxu0 %vm1169_vm3, %v1852_v10  ;;  %v1849_v12 = vmul.f32 %v3220_v11, %v3212_v50 }
 0x5fa   : > { %3002 = vmatpush3.bf16.msra.mxu0 %v2005_v25  ;;  %3003 = vmatprep.mubr.msk.bf16.mxu0 %vm3420_vm1, %v3419_v3 }
 0x5fb   : > { %v1853_v13 = vpack.c.bf16 %v1849_v12, %v1849_v12  ;;  %3013 = vmatprep.subr.bf16.mxu0 %v3419_v3  ;;  %v2804_v12 = vld [vmem:[%s4191_s26] ss:$0 sm:$0xff] }
 0x5fc   : > { %v3222_v24 = vpop.eup %3221 }
 0x5fd   : > { %2998 = vmatmul.mubr.msk.bf16.vlgmr.msra.gmra.mxu1 %vm1169_vm3, %v1853_v13  ;;  %v1850_v14 = vmul.f32 %v3222_v24, %v3214_v53 }
 0x5fe   : > { %3009 = vmatprep.mubr.msk.bf16.mxu1 %vm3420_vm1, %v3419_v3  ;;  %3008 = vmatpush3.bf16.msra.mxu1 %v2067_v17 }
 0x5ff   : > { %v1854_v15 = vpack.c.bf16 %v1850_v14, %v1850_v14  ;;  %3019 = vmatprep.subr.bf16.mxu1 %v3419_v3 }
 0x601   : > { %3004 = vmatmul.mubr.msk.bf16.vlgmr.msra.gmra.mxu0 %vm1169_vm3, %v1854_v15 }
 0x602   : > { %3015 = vmatprep.mubr.msk.bf16.mxu0 %vm3420_vm1, %v3419_v3  ;;  %3014 = vmatpush3.bf16.msra.mxu0 %v2114_v19 }
 0x603   : > { %3025 = vmatprep.subr.bf16.mxu0 %v3419_v3 }
 0x6b5   : > { %v1897_v20 = vpop.f32.mrf.mxu1 }
 0x6b6   : > { %2047 = vst.msk [vmem:[#allocation3 + $0x8] sm:$0xff] %vm1169_vm3, %v1897_v20 }
 0x6b7   : > { %v2987_v4 = vpop.f32.mrf.mxu1 }
 0x6b9   : > { %v1900_v21 = vpop.f32.mrf.mxu1  ;;  %v1945_v22 = vpop.f32.mrf.mxu0 }
 0x6ba   : > { %2048 = vst.msk [vmem:[#allocation3 + $0x18] sm:$0xff] %vm1169_vm3, %v1945_v22 }
 0x6bb   : > { %v2988_v23 = vpop.f32.mrf.mxu1  ;;  %v2993_v27 = vpop.f32.mrf.mxu0 }
 0x6bd   : > { %v2052_v31 = vld [vmem:[#allocation3 + $0x8] sm:$0xff]  ;;  %v1948_v32 = vpop.f32.mrf.mxu0  ;;  %v1993_v33 = vpop.f32.mrf.mxu1 }
 0x6be   : > { %v2059_v34 = vpack.c.bf16 %v2052_v31, %v2051_v29  ;;  %2049 = vst.msk [vmem:[#allocation3 + $0x28] sm:$0xff] %vm1169_vm3, %v1993_v33 }
 0x6bf   : > { %v2994_v37 = vpop.f32.mrf.mxu0  ;;  %v2999_v38 = vpop.f32.mrf.mxu1 }
 0x6c0   : > { %3010 = vmatmul.mubr.msk.bf16.vlgmr.msra.gmra.mxu1 %vm1169_vm3, %v2059_v34 }
 0x6c1   : > { %3020 = vmatpush3.bf16.msra.mxu1 %v2161_v35  ;;  %3021 = vmatprep.mubr.msk.bf16.mxu1 %vm3420_vm1, %v3419_v3  ;;  %v1996_v39 = vpop.f32.mrf.mxu1  ;;  %v2041_v40 = vpop.f32.mrf.mxu0  ;;  %v2054_v42 = vld [vmem:[#allocation3 + $0x18] sm:$0xff] }
 0x6c2   : > { %3031 = vmatprep.subr.bf16.mxu1 %v3419_v3  ;;  %2050 = vst.msk [vmem:[#allocation3 + $0x38] sm:$0xff] %vm1169_vm3, %v2041_v40  ;;  %v2060_v44 = vpack.c.bf16 %v2054_v42, %v2053_v41  ;;  %v3186_v40 = vld [vmem:[%s711_s12] sm:$0xff]  }
 0x6c3   : > { %v3000_v45 = vpop.f32.mrf.mxu1  ;;  %v3005_v30 = vpop.f32.mrf.mxu0  ;;  %v3187_v41 = vld [vmem:[%s3753_s11 + $0x18] sm:$0xff]  }
 0x6c4   : > { %3016 = vmatmul.mubr.msk.bf16.vlgmr.msra.gmra.mxu0 %vm1169_vm3, %v2060_v44 }
 0x6c5   : > { %v2044_v43 = vpop.f32.mrf.mxu0  ;;  %3026 = vmatpush3.bf16.msra.mxu0 %v2208_v36  ;;  %v2056_v47 = vld [vmem:[#allocation3 + $0x28] sm:$0xff]  ;;  %3027 = vmatprep.mubr.msk.bf16.mxu0 %vm3420_vm1, %v3419_v3 }
 0x6c6   : > { %v2061_v48 = vpack.c.bf16 %v2056_v47, %v2055_v46  ;;  %3039 = vmatprep.subr.bf16.mxu0 %v3419_v3 }
 0x6c7   : > { %v3006_v8 = vpop.f32.mrf.mxu0 }
 0x6c8   : > { %3022 = vmatmul.mubr.msk.bf16.vlgmr.msra.gmra.mxu1 %vm1169_vm3, %v2061_v48  ;;  %v2805_v48 = vld [vmem:[%s4193_s21] ss:$0 sm:$0xff] }
 0x6c9   : > { %v2058_v54 = vld [vmem:[#allocation3 + $0x38] sm:$0xff]  ;;  %3035 = vmatprep.mubr.msk.bf16.mxu1 %vm3420_vm1, %v3419_v3 }
 0x6ca   : > { %v2062_v1 = vpack.c.bf16 %v2058_v54, %v2057_v51 }
 0x6cc   : > { %3028 = vmatmul.mubr.msk.bf16.vlgmr.msra.gmra.mxu0 %vm1169_vm3, %v2062_v1  ;;  %v2806_v1 = vld [vmem:[%s4195_s22] ss:$0 sm:$0xff] }
 0x6cd   : > { %3047 = vmatprep.mubr.msk.bf16.mxu0 %vm3420_vm1, %v3419_v3  ;;  %3040 = vmatpush3.bf16.msra.mxu0 %v3187_v41 }
 0x6ce   : > { %3041 = vmatprep.subr.bf16.mxu0 %v3419_v3 }
 0x780   : > { %v2103_v49 = vpop.f32.mrf.mxu1 }
 0x781   : > { %v2251_v60 = vsel %vm934_vm2, %v2103_v49, 0.0 }
 0x782   : > { %v3011_v50 = vpop.f32.mrf.mxu1 }
 0x784   : > { %v2106_v52 = vpop.f32.mrf.mxu1  ;;  %v2150_v53 = vpop.f32.mrf.mxu0 }
 0x785   : > { %v2252_v56 = vsel %vm934_vm2, %v2150_v53, 0.0  ;;  %v2258_v11 = vsel %vm934_vm2, %v2106_v52, 0.0 }
 0x786   : > { %v3012_v55 = vpop.f32.mrf.mxu1  ;;  %v3017_v57 = vpop.f32.mrf.mxu0  ;;  %v2253_v62 = vadd.f32 %v2252_v56, %v2251_v60  ;;  %v3190_v56 = vld [vmem:[%s3753_s11] sm:$0xff]  }
 0x787   : > { %v3188_v55 = vld [vmem:[%s3753_s11 + $0x10] sm:$0xff]   ;;  %v3189_v57 = vld [vmem:[%s3753_s11 + $0x8] sm:$0xff]  }
 0x788   : > { %v2153_v58 = vpop.f32.mrf.mxu0  ;;  %v2197_v59 = vpop.f32.mrf.mxu1  ;;  %3042 = vmatpush3.bf16.msra.mxu0 %v3188_v55 }
 0x789   : > { %v2254_v61 = vsel %vm934_vm2, %v2197_v59, 0.0  ;;  %v2259_v2 = vsel %vm934_vm2, %v2153_v58, 0.0  ;;  %3043 = vmatprep.subr.bf16.mxu0 %v3419_v3  ;;  %v2807_v58 = vld [vmem:[%s849_s20] ss:$0 sm:$0xff] }
 0x78a   : > { %v3018_v63 = vpop.f32.mrf.mxu0  ;;  %v3023_v0 = vpop.f32.mrf.mxu1  ;;  %v2255_v7 = vadd.f32 %v2254_v61, %v2253_v62  ;;  %v2260_v24 = vadd.f32 %v2259_v2, %v2258_v11 }
 0x78c   : > { %v2200_v9 = vpop.f32.mrf.mxu1  ;;  %v2244_v10 = vpop.f32.mrf.mxu0  ;;  %3044 = vmatpush3.bf16.msra.mxu0 %v3189_v57 }
 0x78d   : > { %v2261_v25 = vsel %vm934_vm2, %v2200_v9, 0.0  ;;  %v2256_v13 = vsel %vm934_vm2, %v2244_v10, 0.0  ;;  %3045 = vmatprep.subr.bf16.mxu0 %v3419_v3 }
 0x78e   : > { %v2257_v14 = vadd.f32 %v2256_v13, %v2255_v7  ;;  %v3024_v15 = vpop.f32.mrf.mxu1  ;;  %v3029_v16 = vpop.f32.mrf.mxu0  ;;  %v2262_v17 = vadd.f32 %v2261_v25, %v2260_v24 }
 0x790   : > { %v2271_v18 = vadd.f32 %v2804_v12, %v2257_v14  ;;  %v2247_v19 = vpop.f32.mrf.mxu0  ;;  %3046 = vmatpush3.bf16.msra.mxu0 %v3190_v56 }
 0x791   : > { %v2263_v20 = vsel %vm934_vm2, %v2247_v19, 0.0 }
 0x792   : > { %v2264_v4 = vadd.f32 %v2263_v20, %v2262_v17  ;;  %v3030_v21 = vpop.f32.mrf.mxu0  ;;  %v2273_v22 = vadd.f32 %v2271_v18, %v3774_v5 }
 0x794   : > { %v2272_v23 = vadd.f32 %v2804_v12, %v2264_v4  ;;  %v2275_v26 = vsel %vm934_vm2, %v2273_v22, 0.0 }
 0x795   : > { %2276 = vadd.xlane.f32.xlu0 %v2275_v26 }
 0x796   : > { %v2274_v27 = vadd.f32 %v2272_v23, %v3776_v6  ;;  %v3185_v6 = vld [vmem:[%s711_s12 + $0x8] sm:$0xff]  }
 0x797   : > { %3032 = vmatpush3.bf16.msra.mxu1 %v3185_v6 }
 0x798   : > { %v2278_v29 = vsel %vm934_vm2, %v2274_v27, 0.0  ;;  %3033 = vmatprep.subr.bf16.mxu1 %v3419_v3  ;;  %v2811_v3 = vld [vmem:[%s857_s9] ss:$0 sm:$0xff] }
 0x799   : > { %2279 = vadd.xlane.f32.xlu1 %v2278_v29 }
 0x79b   : > { %3034 = vmatpush3.bf16.msra.mxu1 %v3186_v40 }
 0x81e   : > { %v2277_v31 = vpop.xlane.xlu0 %2276 }
 0x81f   : > { %v2282_v32 = vmul.f32 0.03125, %v2277_v31 }
 0x821   : > { %v2284_v33 = vsub.f32 %v2273_v22, %v2282_v32 }
 0x822   : > { %v2280_v34 = vpop.xlane.xlu1 %2279 }
 0x823   : > { %v2283_v35 = vmul.f32 0.03125, %v2280_v34  ;;  %v2286_v37 = vmul.f32 %v2284_v33, %v2284_v33 }
 0x825   : > { %v2285_v38 = vsub.f32 %v2274_v27, %v2283_v35  ;;  %v2288_v5 = vsel %vm934_vm2, %v2286_v37, 0.0 }
 0x826   : > { %2289 = vadd.xlane.f32.xlu0 %v2288_v5  ;;  %v2817_v5 = vld [vmem:[%s860_s4] ss:$0 sm:$0xff] }
 0x827   : > { %v2287_v28 = vmul.f32 %v2285_v38, %v2285_v38 }
 0x829   : > { %v2291_v39 = vsel %vm934_vm2, %v2287_v28, 0.0 }
 0x82a   : > { %2292 = vadd.xlane.f32.xlu1 %v2291_v39  ;;  %v2818_v39 = vld [vmem:[%s863_s13] ss:$0 sm:$0xff] }
 0x8af   : > { %v2290_v42 = vpop.xlane.xlu0 %2289 }
 0x8b0   : > { %v2294_v44 = vmul.f32 0.03125, %v2290_v42 }
 0x8b2   : > { %v2296_v36 = vadd.f32 1e-05, %v2294_v44 }
 0x8b3   : > { %v2293_v45 = vpop.xlane.xlu1 %2292 }
 0x8b4   : > { %3223 = vrsqrt.f32 %v2296_v36  ;;  %v2295_v30 = vmul.f32 0.03125, %v2293_v45 }
 0x8b6   : > { %v2297_v43 = vadd.f32 1e-05, %v2295_v30 }
 0x8b8   : > { %3225 = vrsqrt.f32 %v2297_v43 }
 0x8c1   : > { %v3224_v46 = vpop.eup %3223 }
 0x8c2   : > { %v2300_v47 = vmul.f32 %v3224_v46, %v2284_v33 }
 0x8c4   : > { %v2308_v54 = vmul.f32 %v2805_v48, %v2300_v47 }
 0x8c5   : > { %v3226_v8 = vpop.eup %3225 }
 0x8c6   : > { %v2301_v51 = vmul.f32 %v3226_v8, %v2285_v38  ;;  %v2316_v50 = vadd.f32 %v2806_v1, %v2308_v54 }
 0x8c8   : > { %v2309_v49 = vmul.f32 %v2805_v48, %v2301_v51 }
 0x8ca   : > { %v2317_v52 = vadd.f32 %v2806_v1, %v2309_v49 }
 0x8cc   : > { %v2318_v53 = vpack.c.bf16 %v2317_v52, %v2316_v50 }
 0x8ce   : > { %3036 = vmatmul.mubr.msk.bf16.vlgmr.msra.gmra.mxu1 %vm934_vm2, %v2318_v53 }
 0x98e   : > { %v2374_v59 = vpop.f32.mrf.mxu1 }
 0x98f   : > { %v2375_v61 = vadd.f32 %v2807_v58, %v2374_v59 }
 0x990   : > { %v3037_v60 = vpop.f32.mrf.mxu1 }
 0x991   : > { %v2381_v2 = vmax.f32 %v2375_v61, 0.0 }
 0x992   : > { %v2377_v62 = vpop.f32.mrf.mxu1 }
 0x993   : > { %v2378_v63 = vadd.f32 %v2807_v58, %v2377_v62 }
 0x994   : > { %v3038_v0 = vpop.f32.mrf.mxu1 }
 0x995   : > { %v2382_v7 = vmax.f32 %v2378_v63, 0.0 }
 0x997   : > { %v2383_v9 = vpack.c.bf16 %v2382_v7, %v2381_v2 }
 0x999   : > { %3048 = vmatmul.mubr.msk.bf16.vlgmr.msra.gmra.mxu0 %vm2414_vm5, %v2383_v9 }
 0xa59   : > { %v2452_v10 = vpop.f32.mrf.mxu0 }
 0xa5a   : > { %v2453_v11 = vadd.f32 %v2811_v3, %v2452_v10 }
 0xa5b   : > { %v3049_v25 = vpop.f32.mrf.mxu0 }
 0xa5c   : > { %v2459_v12 = vadd.f32 %v2453_v11, %v2316_v50 }
 0xa5d   : > { %v2455_v13 = vpop.f32.mrf.mxu0 }
 0xa5e   : > { %v2456_v24 = vadd.f32 %v2811_v3, %v2455_v13  ;;  %v2461_v14 = vsel %vm934_vm2, %v2459_v12, 0.0 }
 0xa5f   : > { %2462 = vadd.xlane.f32.xlu0 %v2461_v14  ;;  %v3050_v15 = vpop.f32.mrf.mxu0 }
 0xa60   : > { %v2460_v16 = vadd.f32 %v2456_v24, %v2317_v52 }
 0xa62   : > { %v2464_v17 = vsel %vm934_vm2, %v2460_v16, 0.0 }
 0xa63   : > { %2465 = vadd.xlane.f32.xlu1 %v2464_v17 }
 0xae8   : > { %v2463_v18 = vpop.xlane.xlu0 %2462 }
 0xae9   : > { %v2467_v19 = vmul.f32 0.03125, %v2463_v18 }
 0xaeb   : > { %v2469_v20 = vsub.f32 %v2459_v12, %v2467_v19 }
 0xaec   : > { %v2466_v4 = vpop.xlane.xlu1 %2465 }
 0xaed   : > { %v2468_v21 = vmul.f32 0.03125, %v2466_v4  ;;  %v2471_v22 = vmul.f32 %v2469_v20, %v2469_v20 }
 0xaef   : > { %v2470_v23 = vsub.f32 %v2460_v16, %v2468_v21  ;;  %v2473_v26 = vsel %vm934_vm2, %v2471_v22, 0.0 }
 0xaf0   : > { %2474 = vadd.xlane.f32.xlu0 %v2473_v26 }
 0xaf1   : > { %v2472_v27 = vmul.f32 %v2470_v23, %v2470_v23 }
 0xaf3   : > { %v2476_v29 = vsel %vm934_vm2, %v2472_v27, 0.0 }
 0xaf4   : > { %2477 = vadd.xlane.f32.xlu1 %v2476_v29 }
 0xb79   : > { %v2475_v31 = vpop.xlane.xlu0 %2474 }
 0xb7a   : > { %v2479_v32 = vmul.f32 0.03125, %v2475_v31 }
 0xb7c   : > { %v2481_v33 = vadd.f32 1e-05, %v2479_v32 }
 0xb7d   : > { %v2478_v34 = vpop.xlane.xlu1 %2477 }
 0xb7e   : > { %3227 = vrsqrt.f32 %v2481_v33  ;;  %v2480_v35 = vmul.f32 0.03125, %v2478_v34 }
 0xb80   : > { %v2482_v37 = vadd.f32 1e-05, %v2480_v35 }
 0xb82   : > { %3229 = vrsqrt.f32 %v2482_v37 }
 0xb8b   : > { %v3228_v38 = vpop.eup %3227 }
 0xb8c   : > { %v2485_v28 = vmul.f32 %v3228_v38, %v2469_v20 }
 0xb8e   : > { %v2493_v6 = vmul.f32 %v2817_v5, %v2485_v28 }
 0xb8f   : > { %v3230_v40 = vpop.eup %3229 }
 0xb90   : > { %v2501_v41 = vadd.f32 %v2818_v39, %v2493_v6  ;;  %v2486_v42 = vmul.f32 %v3230_v40, %v2470_v23 }
 0xb92   : > { %2503 = vst.msk [vmem:[#allocation2] sm:$0xff] %vm934_vm2, %v2501_v41  ;;  %v2494_v44 = vmul.f32 %v2817_v5, %v2486_v42  ;;  %2508 = sbr.rel (%p2819_p3) target bundleno = 2968 (0xb98), region = 116 }
 0xb94   : > { %v2502_v36 = vadd.f32 %v2818_v39, %v2494_v44 }
 0xb96   : > { %2504 = vst.msk [vmem:[#allocation2 + $0x8] sm:$0xff] %vm934_vm2, %v2502_v36 }
 0xb97   : > { %2509 = vst.msk [vmem:[#allocation11] sm:$0xff] %vm934_vm2, %v2501_v41  ;;  %2510 = vst.msk [vmem:[#allocation11 + $0x8] sm:$0xff] %vm934_vm2, %v2502_v36 }
 0xb98 PF: > { %p3086_p6 = scmp.eq.s32.totalorder %s3541_s0, 1  ;;  %s3424_s4 = smov [#allocation11]  }
 0xb99   : > { %s2517_s25 = sshll.u32 %s3424_s4, 4  ;;  %s2518_s25 = int_to_ptr.vmem [resolvable:$true] %s2517_s25 }
 0xb9a   : > { %s3339_s13 = scalar_lea.vmem %s2518_s25, 256  ;;  %p3346_p9 = scmp.lt.s32.totalorder %s2518_s25, %s2518_s25 }
 0xb9b   : > { %p3340_p7 = scmp.ne.s32.totalorder %s2518_s25, %s3339_s13  ;;  %p3347_p5 = scmp.lt.s32.totalorder %s3339_s13, %s3339_s13 }
 0xb9d   : > { %p3341_p11 = pnand %p3340_p7, %p3086_p6  ;;  %p3348_p2 = por %p3347_p5, %p3346_p9 }
 0xb9f   : > { %p3342_p4 = pneg %p3341_p11 }
 0xba1   : > { %p3349_p8 = pnand %p3348_p2, %p3342_p4 }
 0xba3   : > { %3352 = shalt.err (!%p3349_p8)
}
 0xba4   : > { %s3425_s18 = smov 128   ;;  %s3426_s15 = smov 8  }
 0xba5   : > { %s4200_s24 = sld [smem:[#allocation35_spill]] }
 0xbab   : > { %3064 = dma.vmem_to_hbm [thread:$0]  (%p3086_p6), %s2518_s25, 256, %s4200_s24, [#allocation6], %s3425_s18, %s3425_s18, %s3426_s15  }
 0xbac   : > { %3392 = dma.done.wait (%p3086_p6), [#allocation6], 256  }
 0xbad   : > { %3394 = vsyncadd (%p3086_p6), [#allocation6], 4294967040 }
 0xbae PF: > { %s4201_s30 = sld [smem:[#allocation18_spill]] }
 0xbaf   : > { %s4202_s27 = sld [smem:[#allocation16_spill]] }
 0xbb0   : > { %s4203_s28 = sld [smem:[#allocation17_spill]] }
 0xbb1   : > { %s4204_s29 = sld [smem:[#allocation19_spill]] }
 0xbb4   : > { %p28_p10 = scmp.ge.s32.totalorder %s4201_s30, 4  }
 0xbb6   :  { %30 = sbr.rel (!%p28_p10) target bundleno = 21 (0x15), region = 197 }
 0xbbb   :  { %2533 = vsyncpa [#allocation5], 1 }
 0xbbc   :  { %2535 = vsyncpa [#allocation5 + $0x1], 1 }
 0xbbd   :  { %2536 = vsyncpa [#allocation8], 1 }
 0xbbe   :  { %2537 = vsyncpa [#allocation6], 1 }
 0xbbf   :  { %2539 = vsyncpa [#allocation6 + $0x1], 1 }

</bundles_post_ra>
